<compile_context>
chip_gen: v6e
topology: v6e:2x2x1
jax: 0.10.0
libtpu: 0.0.40
codegen_flags: <defaults>
</compile_context>

<pallas_src>
import math

import jax
import jax.numpy as jnp
from jax import lax
from jax.experimental import pallas as pl
from jax.experimental.pallas import tpu as pltpu


_MASK_VALUE = -1e30  # finite large-negative: exp underflows to 0, never NaN


def _round_up(x, m):
    return (x + m - 1) // m * m


def _default_vmem_limit():
    # Re-derive the scoped-VMEM cap per generation (v7x has 64 MiB/TC).
    try:
        cap = int(pltpu.get_tpu_info().vmem_capacity_bytes)
        return min(int(0.75 * cap), 96 * 1024 * 1024)
    except Exception:
        return 48 * 1024 * 1024  # safe on every generation


# ---------------------------------------------------------------------------
# Single-pass kernel: whole (padded) key/value axis resident in VMEM.
# grid = (B*heads, q_tiles); no online softmax, no scratch.
# ---------------------------------------------------------------------------
def _make_single_pass_kernel(scale, n_valid, needs_mask):
    def kernel(q_ref, k_ref, v_ref, o_ref):
        # q_ref: (1, d, bq)   k_ref/v_ref: (1, d, Np)   o_ref: (1, d, bq)
        q = q_ref[0] * scale          # scale the small resident operand
        k = k_ref[0]
        v = v_ref[0]

        # scores: contract dim_head directly (no transpose) -> (Np, bq)
        s = lax.dot_general(k, q, (((0,), (0,)), ((), ())),
                            preferred_element_type=jnp.float32)
        if needs_mask:  # static: only emitted when the pixel axis was padded
            key_idx = lax.broadcasted_iota(jnp.int32, s.shape, 0)
            s = jnp.where(key_idx < n_valid, s, _MASK_VALUE)

        m = jnp.max(s, axis=0, keepdims=True)          # (1, bq) f32
        p = jnp.exp(s - m)                             # (Np, bq) f32
        l = jnp.sum(p, axis=0, keepdims=True)          # (1, bq) f32

        # P@V: contract the key axis, result already (d, bq) lane-dense
        pv = lax.dot_general(v, p.astype(v.dtype), (((1,), (0,)), ((), ())),
                             preferred_element_type=jnp.float32)
        o_ref[0] = (pv * pl.reciprocal(l, approx=True)).astype(o_ref.dtype)

    return kernel


# ---------------------------------------------------------------------------
# Flash-style kernel (online softmax) for large pixel counts.
# grid = (B*heads, q_tiles, kv_tiles), kv innermost ("arbitrary").
# ---------------------------------------------------------------------------
def _make_flash_kernel(scale, n_valid, block_kv, needs_mask):
    def kernel(q_ref, k_ref, v_ref, o_ref, m_ref, l_ref, acc_ref):
        # q_ref: (1, d, bq)   k_ref/v_ref: (1, d, bk)   o_ref: (1, d, bq)
        # m_ref/l_ref: (1, bq) f32 running max / sum;  acc_ref: (d, bq) f32
        ki = pl.program_id(2)

        @pl.when(ki == 0)
        def _init():
            m_ref[...] = jnp.full_like(m_ref, -jnp.inf)
            l_ref[...] = jnp.zeros_like(l_ref)
            acc_ref[...] = jnp.zeros_like(acc_ref)

        q = q_ref[0] * scale          # (d, bq): scale the resident operand
        k = k_ref[0]                  # (d, bk)
        v = v_ref[0]                  # (d, bk)

        s = lax.dot_general(k, q, (((0,), (0,)), ((), ())),
                            preferred_element_type=jnp.float32)   # (bk, bq)
        if needs_mask:
            key_idx = lax.broadcasted_iota(jnp.int32, s.shape, 0) + ki * block_kv
            s = jnp.where(key_idx < n_valid, s, _MASK_VALUE)

        # online softmax (f32 statistics)
        m_prev = m_ref[...]
        m_cur = jnp.max(s, axis=0, keepdims=True)
        m_new = jnp.maximum(m_prev, m_cur)
        alpha = jnp.exp(m_prev - m_new)
        p = jnp.exp(s - m_new)

        l_ref[...] = alpha * l_ref[...] + jnp.sum(p, axis=0, keepdims=True)
        pv = lax.dot_general(v, p.astype(v.dtype), (((1,), (0,)), ((), ())),
                             preferred_element_type=jnp.float32)
        acc_ref[...] = alpha * acc_ref[...] + pv
        m_ref[...] = m_new

        @pl.when(ki == pl.num_programs(2) - 1)
        def _finalize():
            inv_l = pl.reciprocal(l_ref[...], approx=True)
            o_ref[0] = (acc_ref[...] * inv_l).astype(o_ref.dtype)

    return kernel


def _attention_core(q, k, v, *, scale, n_valid, block_q, block_kv,
                    out_dtype, vmem_limit_bytes):
    """q/k/v: (B*heads, dim_head, N_pad); pixels on the lane (last) dim."""
    BH, d, Np = q.shape
    bq, bk = block_q, block_kv
    assert Np % bq == 0 and Np % bk == 0, "padded pixel axis must divide blocks"
    needs_mask = (n_valid != Np)

    if bk == Np:
        # ---- single-pass path: kv axis collapsed, no scratch ----
        kernel = _make_single_pass_kernel(scale, n_valid, needs_mask)
        return pl.pallas_call(
            kernel,
            out_shape=jax.ShapeDtypeStruct((BH, d, Np), out_dtype),
            grid_spec=pltpu.PrefetchScalarGridSpec(
                num_scalar_prefetch=0,
                grid=(BH, Np // bq),
                in_specs=[
                    pl.BlockSpec((1, d, bq), lambda b, qi: (b, 0, qi)),   # q
                    pl.BlockSpec((1, d, Np), lambda b, qi: (b, 0, 0)),    # k (resident across qi)
                    pl.BlockSpec((1, d, Np), lambda b, qi: (b, 0, 0)),    # v
                ],
                out_specs=pl.BlockSpec((1, d, bq), lambda b, qi: (b, 0, qi)),
            ),
            compiler_params=pltpu.CompilerParams(
                dimension_semantics=("parallel", "parallel"),
                vmem_limit_bytes=vmem_limit_bytes,
            ),
        )(q, k, v)

    # ---- flash path: online softmax over kv tiles ----
    kernel = _make_flash_kernel(scale, n_valid, bk, needs_mask)
    return pl.pallas_call(
        kernel,
        out_shape=jax.ShapeDtypeStruct((BH, d, Np), out_dtype),
        grid_spec=pltpu.PrefetchScalarGridSpec(
            num_scalar_prefetch=0,
            grid=(BH, Np // bq, Np // bk),
            in_specs=[
                pl.BlockSpec((1, d, bq), lambda b, qi, ki: (b, 0, qi)),   # q
                pl.BlockSpec((1, d, bk), lambda b, qi, ki: (b, 0, ki)),   # k
                pl.BlockSpec((1, d, bk), lambda b, qi, ki: (b, 0, ki)),   # v
            ],
            out_specs=pl.BlockSpec((1, d, bq), lambda b, qi, ki: (b, 0, qi)),
            scratch_shapes=[
                pltpu.VMEM((1, bq), jnp.float32),   # running max
                pltpu.VMEM((1, bq), jnp.float32),   # running sum
                pltpu.VMEM((d, bq), jnp.float32),   # f32 accumulator
            ],
        ),
        compiler_params=pltpu.CompilerParams(
            dimension_semantics=("parallel", "parallel", "arbitrary"),
            vmem_limit_bytes=vmem_limit_bytes,
        ),
    )(q, k, v)


# ---------------------------------------------------------------------------
# Wrapper: NCHW in/out, 1x1-conv projections as XLA einsums
# ---------------------------------------------------------------------------
def attention_pallas(x_nchw, w_qkv, w_out, b_out, *, heads, dim_head,
                     block_q=512, block_kv=512,
                     compute_dtype=jnp.bfloat16,
                     max_single_pass_kv=4096,
                     vmem_limit_bytes=None):
    """x_nchw: (B, C, H, W); w_qkv: (3*heads*dim_head, C);
    w_out: (C, heads*dim_head); b_out: (C,).  Returns (B, C, H, W)."""
    B, C, H, W = x_nchw.shape
    N = H * W
    hidden = heads * dim_head
    scale = dim_head ** (-0.5)
    if vmem_limit_bytes is None:
        vmem_limit_bytes = _default_vmem_limit()

    x_flat = x_nchw.reshape(B, C, N)
    # to_qkv: 1x1 conv (no bias) == channel matmul (tiny C; left to XLA).
    qkv = jnp.einsum('oc,bcn->bon', w_qkv, x_flat)            # (B, 3*hidden, N)
    q, k, v = jnp.split(qkv, 3, axis=1)                       # (B, hidden, N) each
    # 'b (h d) n -> (b h) d n' : pure reshape, no transpose.
    q = q.reshape(B * heads, dim_head, N)
    k = k.reshape(B * heads, dim_head, N)
    v = v.reshape(B * heads, dim_head, N)

    if compute_dtype is not None:
        q = q.astype(compute_dtype)
        k = k.astype(compute_dtype)
        v = v.astype(compute_dtype)

    # Lane-dense tiling of the pixel axis.
    N128 = _round_up(N, 128)
    bq = min(block_q, N128)
    if N128 <= max_single_pass_kv:
        Np = _round_up(N, bq)
        bk = Np                               # kv axis collapses to one block
    else:
        bk = min(block_kv, N128)
        assert max(bq, bk) % min(bq, bk) == 0
        Np = _round_up(N, max(bq, bk))
    if Np != N:
        pad = [(0, 0), (0, 0), (0, Np - N)]
        q = jnp.pad(q, pad)
        k = jnp.pad(k, pad)
        v = jnp.pad(v, pad)

    out = _attention_core(q, k, v, scale=scale, n_valid=N,
                          block_q=bq, block_kv=bk, out_dtype=x_nchw.dtype,
                          vmem_limit_bytes=vmem_limit_bytes)

    # '(b h) d n -> b (h d) n' : pure reshape (channel = h*dim_head + d).
    out = out[:, :, :N].reshape(B, hidden, N)

    # to_out: 1x1 conv with bias (XLA).
    y = jnp.einsum('ch,bhn->bcn', w_out, out) + b_out[None, :, None]
    return y.reshape(B, C, H, W)


# ---------------------------------------------------------------------------
# Pure-JAX reference (mirrors the PyTorch forward exactly)
# ---------------------------------------------------------------------------
def attention_reference(x_nchw, w_qkv, w_out, b_out, *, heads, dim_head):
    B, C, H, W = x_nchw.shape
    N = H * W
    hidden = heads * dim_head
    scale = dim_head ** (-0.5)

    x_flat = x_nchw.reshape(B, C, N)
    qkv = jnp.einsum('oc,bcn->bon', w_qkv, x_flat)            # (B, 3*hidden, N)
    q, k, v = jnp.split(qkv, 3, axis=1)
    q = q.reshape(B, heads, dim_head, N) * scale
    k = k.reshape(B, heads, dim_head, N)
    v = v.reshape(B, heads, dim_head, N)
    sim = jnp.einsum('bhdi,bhdj->bhij', q, k)
    attn = jax.nn.softmax(sim, axis=-1)
    out = jnp.einsum('bhij,bhdj->bhid', attn, v)              # (B, heads, N, d)
    out = jnp.transpose(out, (0, 1, 3, 2)).reshape(B, hidden, N)
    y = jnp.einsum('ch,bhn->bcn', w_out, out) + b_out[None, :, None]
    return y.reshape(B, C, H, W)


# ---------------------------------------------------------------------------
if __name__ == "__main__":
    B, DIM, H, W = 2, 4, 16, 16          # N = 256
    HEADS, DIM_HEAD = 4, 32
    HIDDEN = HEADS * DIM_HEAD

    key = jax.random.PRNGKey(0)
    kx, kq, kw, kb = jax.random.split(key, 4)

    x = jax.random.normal(kx, (B, DIM, H, W), dtype=jnp.float32)
    # Deterministic parameters (shapes match the nn.Conv2d 1x1 weights, squeezed).
    w_qkv = jax.random.normal(kq, (3 * HIDDEN, DIM), dtype=jnp.float32) * (1.0 / math.sqrt(DIM))
    w_out = jax.random.normal(kw, (DIM, HIDDEN), dtype=jnp.float32) * (1.0 / math.sqrt(HIDDEN))
    b_out = jax.random.normal(kb, (DIM,), dtype=jnp.float32) * 0.01

    y_ref = attention_reference(x, w_qkv, w_out, b_out, heads=HEADS, dim_head=DIM_HEAD)

    # 1) f32 operands, single-pass path (kv axis collapsed) -- tight check.
    y32 = attention_pallas(x, w_qkv, w_out, b_out, heads=HEADS, dim_head=DIM_HEAD,
                           compute_dtype=jnp.float32)
    y32 = jax.block_until_ready(y32)
    assert y32.shape == (B, DIM, H, W)
    assert jnp.allclose(y32, y_ref, atol=5e-3, rtol=5e-3), "f32 single-pass mismatch"

    # 2) default path: bf16 MXU operands, f32 stats/accumulation -- looser check.
    y16 = attention_pallas(x, w_qkv, w_out, b_out, heads=HEADS, dim_head=DIM_HEAD)
    y16 = jax.block_until_ready(y16)
    assert jnp.allclose(y16, y_ref, atol=5e-2, rtol=5e-2), "bf16 default mismatch"

    # 3) forced flash (multi-kv-tile) path with a padded/masked pixel axis.
    x2 = jax.random.normal(kx, (B, DIM, 12, 12), dtype=jnp.float32)   # N=144 -> Np=256
    y2_ref = attention_reference(x2, w_qkv, w_out, b_out, heads=HEADS, dim_head=DIM_HEAD)
    y2 = attention_pallas(x2, w_qkv, w_out, b_out, heads=HEADS, dim_head=DIM_HEAD,
                          block_q=128, block_kv=128, max_single_pass_kv=0,
                          compute_dtype=jnp.float32)
    y2 = jax.block_until_ready(y2)
    assert jnp.allclose(y2, y2_ref, atol=5e-3, rtol=5e-3), "flash/padded mismatch"

    # 4) single-pass path with padded / masked keys (8x8 -> N=64 padded to 128).
    x3 = jax.random.normal(kx, (B, DIM, 8, 8), dtype=jnp.float32)
    y3_ref = attention_reference(x3, w_qkv, w_out, b_out, heads=HEADS, dim_head=DIM_HEAD)
    y3 = attention_pallas(x3, w_qkv, w_out, b_out, heads=HEADS, dim_head=DIM_HEAD,
                          compute_dtype=jnp.float32)
    y3 = jax.block_until_ready(y3)
    assert jnp.allclose(y3, y3_ref, atol=5e-3, rtol=5e-3), "single-pass/padded mismatch"

    print("KERNEL_OK")
</pallas_src>

<mosaic_0001>
module attributes {stable_mosaic.version = 11 : i64} {
  func.func @kernel(%arg0: i32, %arg1: i32, %arg2: memref<1x32x256xf32, #tpu.memory_space<vmem>>, %arg3: memref<1x32x256xf32, #tpu.memory_space<vmem>>, %arg4: memref<1x32x256xf32, #tpu.memory_space<vmem>>, %arg5: memref<1x32x256xf32, #tpu.memory_space<vmem>>) attributes {dimension_semantics = [#tpu.dimension_semantics<parallel>, #tpu.dimension_semantics<parallel>], iteration_bounds = array<i64: 8, 1>, scalar_prefetch = 0 : i64, scratch_operands = 0 : i64, tpu.core_type = #tpu.core_type<tc>, window_params = [{transform_indices = @transform_0, window_bounds = array<i64: 1, 32, 256>}, {transform_indices = @transform_1, window_bounds = array<i64: 1, 32, 256>}, {transform_indices = @transform_2, window_bounds = array<i64: 1, 32, 256>}, {transform_indices = @transform_3, window_bounds = array<i64: 1, 32, 256>}]} {
    %c0 = arith.constant 0 : index
    %c0_0 = arith.constant 0 : index
    %c0_1 = arith.constant 0 : index
    %0 = vector.load %arg2[%c0, %c0_0, %c0_1] : memref<1x32x256xf32, #tpu.memory_space<vmem>>, vector<1x32x256xf32>
    %1 = vector.shape_cast %0 : vector<1x32x256xf32> to vector<32x256xf32>
    %cst = arith.constant 0.176776692 : f32
    %2 = vector.broadcast %cst : f32 to vector<32x256xf32>
    %3 = arith.mulf %1, %2 : vector<32x256xf32>
    %c0_2 = arith.constant 0 : index
    %c0_3 = arith.constant 0 : index
    %c0_4 = arith.constant 0 : index
    %4 = vector.load %arg3[%c0_2, %c0_3, %c0_4] : memref<1x32x256xf32, #tpu.memory_space<vmem>>, vector<1x32x256xf32>
    %5 = vector.shape_cast %4 : vector<1x32x256xf32> to vector<32x256xf32>
    %c0_5 = arith.constant 0 : index
    %c0_6 = arith.constant 0 : index
    %c0_7 = arith.constant 0 : index
    %6 = vector.load %arg4[%c0_5, %c0_6, %c0_7] : memref<1x32x256xf32, #tpu.memory_space<vmem>>, vector<1x32x256xf32>
    %7 = vector.shape_cast %6 : vector<1x32x256xf32> to vector<32x256xf32>
    %cst_8 = arith.constant dense<0.000000e+00> : vector<256x256xf32>
    %8 = tpu.matmul %5, %3, %cst_8 {dimension_numbers = #tpu.dot_dimension_numbers<[0], [0], [1], [1], [0, 1, 1, 1], [], []>} : vector<32x256xf32>, vector<32x256xf32>, vector<256x256xf32> -> vector<256x256xf32>
    %cst_9 = arith.constant dense<0xFF800000> : vector<256xf32>
    %9 = vector.multi_reduction <maximumf>, %8, %cst_9 [0] : vector<256x256xf32> to vector<256xf32>
    %10 = vector.shape_cast %9 : vector<256xf32> to vector<1x256xf32>
    %11 = vector.broadcast %10 : vector<1x256xf32> to vector<256x256xf32>
    %12 = arith.subf %8, %11 : vector<256x256xf32>
    %13 = math.exp %12 : vector<256x256xf32>
    %cst_10 = arith.constant dense<0.000000e+00> : vector<256xf32>
    %14 = vector.multi_reduction <add>, %13, %cst_10 [0] : vector<256x256xf32> to vector<256xf32>
    %15 = vector.shape_cast %14 : vector<256xf32> to vector<1x256xf32>
    %cst_11 = arith.constant dense<0.000000e+00> : vector<32x256xf32>
    %16 = tpu.matmul %7, %13, %cst_11 {dimension_numbers = #tpu.dot_dimension_numbers<[1], [0], [0], [1], [0, 0, 1, 1], [], []>} : vector<32x256xf32>, vector<256x256xf32>, vector<32x256xf32> -> vector<32x256xf32>
    %17 = tpu.reciprocal %15 {approx = true} : vector<1x256xf32> -> vector<1x256xf32>
    %18 = vector.broadcast %17 : vector<1x256xf32> to vector<32x256xf32>
    %19 = arith.mulf %16, %18 : vector<32x256xf32>
    %c0_12 = arith.constant 0 : index
    %c0_13 = arith.constant 0 : index
    %c0_14 = arith.constant 0 : index
    %20 = vector.load %arg5[%c0_12, %c0_13, %c0_14] : memref<1x32x256xf32, #tpu.memory_space<vmem>>, vector<1x32x256xf32>
    %21 = vector.shape_cast %20 : vector<1x32x256xf32> to vector<32x256xf32>
    %22 = vector.shape_cast %19 : vector<32x256xf32> to vector<1x32x256xf32>
    tpu.vector_store %arg5[%c0_12, %c0_13, %c0_14], %22 {strides = array<i32>} : memref<1x32x256xf32, #tpu.memory_space<vmem>>, vector<1x32x256xf32>,
    return
  }
  func.func @transform_0(%arg0: i32, %arg1: i32) -> (i32, i32, i32) {
    %c0_i32 = arith.constant 0 : i32
    %c0_i32_0 = arith.constant 0 : i32
    return %arg0, %c0_i32, %arg1 : i32, i32, i32
  }
  func.func @transform_1(%arg0: i32, %arg1: i32) -> (i32, i32, i32) {
    %c0_i32 = arith.constant 0 : i32
    %c0_i32_0 = arith.constant 0 : i32
    %c0_i32_1 = arith.constant 0 : i32
    return %arg0, %c0_i32, %c0_i32_0 : i32, i32, i32
  }
  func.func @transform_2(%arg0: i32, %arg1: i32) -> (i32, i32, i32) {
    %c0_i32 = arith.constant 0 : i32
    %c0_i32_0 = arith.constant 0 : i32
    %c0_i32_1 = arith.constant 0 : i32
    return %arg0, %c0_i32, %c0_i32_0 : i32, i32, i32
  }
  func.func @transform_3(%arg0: i32, %arg1: i32) -> (i32, i32, i32) {
    %c0_i32 = arith.constant 0 : i32
    %c0_i32_0 = arith.constant 0 : i32
    return %arg0, %c0_i32, %arg1 : i32, i32, i32
  }
}

</mosaic_0001>

<bundles_post_ra>
// kernel: tpu_custom_call.1
= control target key start
LH: loop header
LB: loop body
LE: loop exit
PB: predicated region body
PF: predicated region fallthrough
CT: control target
= control target key end

     0   :  { %s2621_s0 = inlined_call_operand.hbm [shape: f32[8,32,256], index: 0, kind: input, shape index: {}]   ;;  %s2622_s1 = inlined_call_operand.hbm [shape: f32[8,32,256], index: 1, kind: input, shape index: {}]   ;;  %s2623_s2 = inlined_call_operand.hbm [shape: f32[8,32,256], index: 2, kind: input, shape index: {}]   ;;  %s2624_s3 = inlined_call_operand.hbm [shape: f32[8,32,256], index: 3, kind: output, shape index: {}]  }
   0x1   :  { %2650 = sst [smem:[#allocation30_spill]] %s2622_s1 }
   0x2   :  { %8 = vsyncpa [#allocation3], 0 }
   0x3   :  { %10 = vsyncpa [#allocation3 + $0x1], 0 }
   0x4   :  { %11 = vsyncpa [#allocation6], 0 }
   0x5   :  { %13 = vsyncpa [#allocation6 + $0x1], 0 }
   0x6   :  { %14 = vsyncpa [#allocation4], 0 }
   0x7   :  { %16 = vsyncpa [#allocation4 + $0x1], 0  ;;  %s1796_s12 = smov 0   ;;  %s1798_s13 = smov 0  }
   0x8   :  { %s1800_s14 = smov 0   ;;  %s1802_s15 = smov 0  }
   0x9   :  { %s1804_s16 = smov 0   ;;  %s1806_s17 = smov 0  }
   0xa LB: > { %2651 = sst [smem:[#allocation12_spill]] %s1761_s16  ;;  %s1827_s18 = sadd.s32 4294967295, %s1765_s17   ;;  %s1765_s17 = sphi %s1806_s17, %s22_s17   ;;  %s1761_s16 = sphi %s1804_s16, %s2705_s16   ;;  %s1757_s15 = sphi %s1802_s15, %s2704_s15   ;;  %s1753_s14 = sphi %s1800_s14, %s2708_s14   ;;  %s1749_s13 = sphi %s1798_s13, %s2707_s13   ;;  %s1745_s12 = sphi %s1796_s12, %s2706_s12  }
   0xb   : > { %s1330_s19 = sadd.s32 4294967294, %s1765_s17   ;;  %s34_s20 = sadd.s32 1, %s1761_s16 }
   0xc   : > { %s43_s21 = sadd.s32 1, %s1753_s14  ;;  %p36_p0 = scmp.ge.s32.totalorder %s34_s20, 8 }
   0xd   : > { %p50_p1 = scmp.ne.s32.totalorder %s1753_s14, %s1749_s13  ;;  %p51_p2 = scmp.eq.s32.totalorder %s1765_s17, 0 }
   0xe   : > { %p56_p3 = scmp.ne.s32.totalorder %s1749_s13, %s1745_s12  ;;  %s2710_s20 = smov (%p36_p0, %s34_s20), 0 }
   0xf   : > { %2652 = sst [smem:[#allocation13_spill]] %s2710_s20  ;;  %p1839_p4 = por %p51_p2, %p50_p1 }
  0x10   : > { %p57_p5 = scmp.eq.s32.totalorder %s1827_s18, 0  ;;  %s38_s23 = ssub.s32 %s1761_s16, %s2710_s20 }
  0x11   : > { %p134_p6 = scmp.eq.s32.totalorder %s1827_s18, 7  ;;  %p41_p7 = scmp.eq.s32.totalorder %s38_s23, 0 }
  0x12   : > { %p1847_p8 = por %p57_p5, %p56_p3  ;;  %p140_p10 = scmp.eq.s32.totalorder %s1330_s19, 7 }
  0x13   : > { %p1851_p9 = por %p134_p6, %p50_p1  ;;  %p1410_p12 = scmp.lt.s32.totalorder %s1765_s17, 8 }
  0x14   : > { %s1856_s26 = scalar_select %p41_p7, %s1753_s14, %s43_s21  }
  0x15   : > { %p1858_p11 = por %p140_p10, %p56_p3  ;;  %s2625_s28 = sand.u32 1, %s1753_s14  }
  0x16   : > { %2656 = sst [smem:[#allocation14_spill]] %s1856_s26  ;;  %s1866_s29 = sshll.u32 %s2625_s28, 6 }
  0x17   : > { %s1869_s30 = sshll.u32 %s1761_s16, 10  ;;  %p1873_p13 = pnand %p1410_p12, %p1839_p4 }
  0x18   : > { %s183_s5 = sand.u32 1, %s1765_s17   ;;  %s2659_s1 = sld [smem:[#allocation30_spill]] }
  0x19   : > { %s187_s9 = scalar_lea.vmem [#allocation5], %s1866_s29  ;;  %p1342_p0 = scmp.ge.s32.totalorder %s1765_s17, 1 }
  0x1a   : > { %s194_s10 = sshll.u32 %s187_s9, 4  ;;  %p223_p1 = scmp.lt.s32.totalorder %s1765_s17, 9  ;;  %s195_s10 = int_to_ptr.vmem [resolvable:$true] %s194_s10 }
  0x1b   : > { %s1885_s11 = scalar_lea.sflag [#allocation6], %s183_s5  ;;  %p1599_p2 = pneg %p1873_p13 }
  0x1c   : > { %s1610_s19 = scalar_lea.vmem %s195_s10, 1024  ;;  %s1767_s21 = smov [#allocation5]  }
  0x1d   : > { %p1611_p3 = scmp.ne.s32.totalorder %s195_s10, %s1610_s19  ;;  %s1615_s22 = sshll.u32 %s1767_s21, 4  ;;  %s1616_s22 = int_to_ptr.vmem [resolvable:$false] %s1615_s22 }
  0x1e   : > { %s193_s8 = scalar_lea.hbm %s2659_s1, %s1869_s30  ;;  %s1617_s23 = scalar_lea.vmem %s1616_s22, 2048 }
  0x1f   : > { %p1613_p4 = pnand %p1611_p3, %p1599_p2  ;;  %p1618_p6 = scmp.lt.s32.totalorder %s195_s10, %s1616_s22 }
  0x20   : > { %p1619_p7 = scmp.lt.s32.totalorder %s1617_s23, %s1610_s19 }
  0x21   : > { %p1614_p5 = pneg %p1613_p4 }
  0x22   : > { %p1620_p10 = por %p1619_p7, %p1618_p6 }
  0x24   : > { %p1621_p12 = pnand %p1620_p10, %p1614_p5 }
  0x26   : > { %1624 = shalt.err (!%p1621_p12)
}
  0x27   : > { %s2628_s6 = smov 256   ;;  %s1769_s5 = smov 16  }
  0x28   : > { %1402 = dma.hbm_to_vmem [thread:$0]  (!%p1873_p13), %s193_s8, 1024, %s195_s10, %s1885_s11, %s2628_s6, %s2628_s6, %s1769_s5  }
  0x29   : > { %p1902_p3 = pnand %p1342_p0, %p223_p1  ;;  %s172_s21 = scalar_lea.hbm %s2621_s0, %s1869_s30 }
  0x2a   : > { %s164_s22 = scalar_lea.vmem [#allocation2], %s1866_s29  ;;  %s214_s20 = scalar_lea.hbm %s2623_s2, %s1869_s30 }
  0x2b   : > { %s173_s23 = sshll.u32 %s164_s22, 4  ;;  %s2661_s16 = sand.u32 1, %s1753_s14   ;;  %s174_s23 = int_to_ptr.vmem [resolvable:$true] %s173_s23 }
  0x2c   : > { %s161_s26 = scalar_lea.sflag [#allocation3], %s2661_s16  ;;  %s1638_s8 = scalar_lea.vmem %s174_s23, 1024 }
  0x2d   : > { %p1639_p4 = scmp.ne.s32.totalorder %s174_s23, %s1638_s8  ;;  %s1770_s10 = smov [#allocation2]  }
  0x2e   : > { %s1643_s6 = sshll.u32 %s1770_s10, 4  ;;  %s1644_s6 = int_to_ptr.vmem [resolvable:$false] %s1643_s6 }
  0x2f   : > { %p1641_p0 = pnand %p1639_p4, %p1599_p2  ;;  %s1645_s9 = scalar_lea.vmem %s1644_s6, 2048 }
  0x30   : > { %p1646_p5 = scmp.lt.s32.totalorder %s174_s23, %s1644_s6  ;;  %p1647_p6 = scmp.lt.s32.totalorder %s1645_s9, %s1638_s8 }
  0x31   : > { %p1642_p1 = pneg %p1641_p0 }
  0x32   : > { %p1648_p7 = por %p1647_p6, %p1646_p5 }
  0x34   : > { %p1649_p10 = pnand %p1648_p7, %p1642_p1 }
  0x36   : > { %1652 = shalt.err (!%p1649_p10)
}
  0x37   : > { %s2662_s1 = smov 256   ;;  %s208_s16 = scalar_lea.vmem [#allocation7], %s1866_s29 }
  0x38   : > { %1399 = dma.hbm_to_vmem [thread:$0]  (!%p1873_p13), %s172_s21, 1024, %s174_s23, %s161_s26, %s2662_s1, %s2662_s1, %s1769_s5  }
  0x39   : > { %s215_s28 = sshll.u32 %s208_s16, 4  ;;  %s1771_s6 = smov [#allocation7]   ;;  %s216_s28 = int_to_ptr.vmem [resolvable:$true] %s215_s28 }
  0x3a   : > { %s1666_s19 = scalar_lea.vmem %s216_s28, 1024  ;;  %s1671_s22 = sshll.u32 %s1771_s6, 4  ;;  %s1672_s22 = int_to_ptr.vmem [resolvable:$false] %s1671_s22 }
  0x3b   : > { %p1667_p12 = scmp.ne.s32.totalorder %s216_s28, %s1666_s19  ;;  %s1673_s8 = scalar_lea.vmem %s1672_s22, 2048 }
  0x3c   : > { %p1674_p1 = scmp.lt.s32.totalorder %s216_s28, %s1672_s22  ;;  %p1675_p5 = scmp.lt.s32.totalorder %s1673_s8, %s1666_s19 }
  0x3d   : > { %p1669_p4 = pnand %p1667_p12, %p1599_p2 }
  0x3e   : > { %p1676_p6 = por %p1675_p5, %p1674_p1 }
  0x3f   : > { %p1670_p0 = pneg %p1669_p4 }
  0x41   : > { %p1677_p7 = pnand %p1676_p6, %p1670_p0 }
  0x43   : > { %1680 = shalt.err (!%p1677_p7)
}
  0x44   : > { %1405 = dma.hbm_to_vmem [thread:$0]  (!%p1873_p13), %s214_s20, 1024, %s216_s28, %s1885_s11, %s2662_s1, %s2662_s1, %s1769_s5  }
  0x45   : > { %227 = sbr.rel (%p1902_p3) target bundleno = 889 (0x379), region = 32 }
  0x4a   : > { %s1943_s21 = sand.u32 1, %s1749_s13  }
  0x4b   : > { %s1946_s4 = sshll.u32 %s1943_s21, 6  ;;  %s230_s23 = scalar_lea.sflag [#allocation3], %s1943_s21 }
  0x4c   : > { %s1950_s10 = scalar_lea.vmem [#allocation2], %s1946_s4 }
  0x4d   : > { %1732 = dma.done.wait (%p1847_p8), %s230_s23, 1024  }
  0x4e   : > { %1734 = vsyncadd (%p1847_p8), %s230_s23, 4294966272  ;;  %s238_s20 = sand.u32 1, %s1827_s18   ;;  %s1958_s11 = scalar_lea.vmem [#allocation5], %s1946_s4 }
  0x4f   : > { %s239_s30 = scalar_lea.sflag [#allocation6], %s238_s20 }
  0x50   : > { %1736 = dma.done.wait (%p1847_p8), %s239_s30, 2048  }
  0x51   : > { %1738 = vsyncadd (%p1847_p8), %s239_s30, 4294965248  ;;  %v1772_v0 = vmov 0.0   ;;  %v302_v1 = vld [vmem:[%s1958_s11] sm:$0xff]  ;;  %v303_v2 = vld [vmem:[%s1958_s11 + $0x8] sm:$0xff]  ;;  %vm382_vm0 = vcmask 261120   ;;  %s2247_s18 = scalar_lea.vmem [#allocation7], %s1946_s4 }
  0x52   : > { %543 = vmatprep.mubr.f32.mxu0 %v1772_v0  ;;  %318 = vxpose.xlu0.b32.start [1/4] (short) %v302_v1, 128  ;;  %v304_v3 = vld [vmem:[%s1958_s11 + $0x10] sm:$0xff]  ;;  %v305_v4 = vld [vmem:[%s1958_s11 + $0x18] sm:$0xff]  ;;  %v291_v8 = vld [vmem:[%s1950_s10 + $0x28] sm:$0xff]  ;;  %s283_s24 = scalar_lea.vmem [#allocation8], %s1946_s4  ;;  %s1387_s7 = sshll.u32 %s1757_s15, 10 }
  0x53   : > { %350 = vxpose.xlu1.b32.start [1/4] (short) %v303_v2, 128  ;;  %v293_v5 = vld [vmem:[%s1950_s10 + $0x38] sm:$0xff]  ;;  %v292_v7 = vld [vmem:[%s1950_s10 + $0x30] sm:$0xff]  ;;  %v290_v9 = vld [vmem:[%s1950_s10 + $0x20] sm:$0xff]  ;;  %v299_v11 = vmul.f32 0.17677669, %v291_v8  ;;  %s1199_s5 = sshll.u32 %s283_s24, 4  ;;  %s2574_s16 = scalar_lea.hbm %s2624_s3, %s1387_s7  ;;  %s2569_s5 = int_to_ptr.vmem [resolvable:$true] %s1199_s5 }
  0x54   : > { %v301_v6 = vmul.f32 0.17677669, %v293_v5  ;;  %v300_v10 = vmul.f32 0.17677669, %v292_v7  ;;  %v298_v12 = vmul.f32 0.17677669, %v290_v9 }
  0x55   : > { %v289_v13 = vld [vmem:[%s1950_s10 + $0x18] sm:$0xff]  ;;  %v288_v14 = vld [vmem:[%s1950_s10 + $0x10] sm:$0xff]  ;;  %v287_v15 = vld [vmem:[%s1950_s10 + $0x8] sm:$0xff]  ;;  %s1184_s28 = scalar_lea.sflag [#allocation4], %s1943_s21  ;;  %s1681_s19 = scalar_lea.vmem %s2569_s5, 1024 }
  0x56   : > { %319 = vxpose.xlu0.b32.cont [2/4] (short) %v304_v3, 128  ;;  %503 = vmatprep.subr.mxu0 %v301_v6  ;;  %v306_v16 = vld [vmem:[%s1958_s11 + $0x20] sm:$0xff]  ;;  %v297_v17 = vmul.f32 0.17677669, %v289_v13  ;;  %v296_v18 = vmul.f32 0.17677669, %v288_v14  ;;  %v307_v19 = vld [vmem:[%s1958_s11 + $0x28] sm:$0xff]  ;;  %p1682_p8 = scmp.ne.s32.totalorder %s2569_s5, %s1681_s19 }
  0x57   : > { %351 = vxpose.xlu1.b32.cont [2/4] (short) %v305_v4, 128  ;;  %504 = vmatpush1.msra.mxu0 %v300_v10  ;;  %v295_v20 = vmul.f32 0.17677669, %v287_v15  ;;  %v286_v21 = vld [vmem:[%s1950_s10] sm:$0xff]  ;;  %v308_v23 = vld [vmem:[%s1958_s11 + $0x30] sm:$0xff]  ;;  %v309_v24 = vld [vmem:[%s1958_s11 + $0x38] sm:$0xff]  ;;  %s1773_s15 = smov [#allocation8]  }
  0x58   : > { %505 = vmatprep.subr.mxu0 %v299_v11  ;;  %v294_v22 = vmul.f32 0.17677669, %v286_v21  ;;  %p1683_p13 = pnand %p1682_p8, %p1851_p9  ;;  %s1685_s6 = sshll.u32 %s1773_s15, 4  ;;  %s1686_s6 = int_to_ptr.vmem [resolvable:$false] %s1685_s6 }
  0x59   : > { %506 = vmatpush1.msra.mxu0 %v298_v12  ;;  %s1687_s22 = scalar_lea.vmem %s1686_s6, 2048  ;;  %p1688_p3 = scmp.lt.s32.totalorder %s2569_s5, %s1686_s6 }
  0x5a   : > { %320 = vxpose.xlu0.b32.cont [3/4] (short) %v306_v16, 128  ;;  %507 = vmatprep.subr.mxu0 %v297_v17  ;;  %p1684_p2 = pneg %p1683_p13  ;;  %p1689_p10 = scmp.lt.s32.totalorder %s1687_s22, %s1681_s19 }
  0x5b   : > { %352 = vxpose.xlu1.b32.cont [3/4] (short) %v307_v19, 128  ;;  %508 = vmatpush1.msra.mxu0 %v296_v18 }
  0x5c   : > { %509 = vmatprep.subr.mxu0 %v295_v20  ;;  %p1690_p12 = por %p1689_p10, %p1688_p3 }
  0x5d   : > { %510 = vmatpush1.msra.mxu0 %v294_v22 }
  0x5e   : > { %321 = vxpose.xlu0.b32.end [4/4] (short) %v308_v23, 128  ;;  %p1691_p4 = pnand %p1690_p12, %p1684_p2 }
  0x5f   : > { %353 = vxpose.xlu1.b32.end [4/4] (short) %v309_v24, 128 }
  0xce   : > { %v334_v25 = vpop.trf.xlu0 }
  0xcf   : > { %1347 = vmatmul.mubr.msk.f32.vlgmr.msra.gmra.mxu0 %vm382_vm0, %v334_v25  ;;  %v366_v34 = vpop.trf.xlu1 }
  0xd0   : > { %549 = vmatprep.mubr.f32.mxu0 %v1772_v0 }
  0xd2   : > { %v335_v26 = vpop.trf.xlu0 }
  0xd3   : > { %1348 = vmatmul.mubr.msk.f32.gmra.mxu0 %vm382_vm0, %v335_v26  ;;  %v367_v36 = vpop.trf.xlu1 }
  0xd4   : > { %555 = vmatprep.mubr.f32.mxu0 %v1772_v0 }
  0xd6   : > { %v336_v27 = vpop.trf.xlu0 }
  0xd7   : > { %1349 = vmatmul.mubr.msk.f32.gmra.mxu0 %vm382_vm0, %v336_v27  ;;  %v368_v39 = vpop.trf.xlu1 }
  0xd8   : > { %561 = vmatprep.mubr.f32.mxu0 %v1772_v0 }
  0xda   : > { %v337_v28 = vpop.trf.xlu0 }
  0xdb   : > { %1350 = vmatmul.mubr.msk.f32.gmra.mxu0 %vm382_vm0, %v337_v28  ;;  %v369_v41 = vpop.trf.xlu1 }
  0xdc   : > { %567 = vmatprep.mubr.f32.mxu0 %v1772_v0 }
  0xde   : > { %v338_v29 = vpop.trf.xlu0 }
  0xdf   : > { %1351 = vmatmul.mubr.msk.f32.gmra.mxu0 %vm382_vm0, %v338_v29  ;;  %v370_v44 = vpop.trf.xlu1 }
  0xe0   : > { %573 = vmatprep.mubr.f32.mxu0 %v1772_v0 }
  0xe2   : > { %v339_v30 = vpop.trf.xlu0 }
  0xe3   : > { %1352 = vmatmul.mubr.msk.f32.gmra.mxu0 %vm382_vm0, %v339_v30  ;;  %v371_v46 = vpop.trf.xlu1 }
  0xe4   : > { %579 = vmatprep.mubr.f32.mxu0 %v1772_v0 }
  0xe6   : > { %v340_v31 = vpop.trf.xlu0 }
  0xe7   : > { %1353 = vmatmul.mubr.msk.f32.gmra.mxu0 %vm382_vm0, %v340_v31  ;;  %v372_v47 = vpop.trf.xlu1 }
  0xe8   : > { %585 = vmatprep.mubr.f32.mxu0 %v1772_v0 }
  0xea   : > { %v341_v32 = vpop.trf.xlu0 }
  0xeb   : > { %1354 = vmatmul.mubr.msk.f32.gmra.mxu0 %vm382_vm0, %v341_v32  ;;  %v373_v48 = vpop.trf.xlu1 }
  0xec   : > { %591 = vmatprep.mubr.f32.mxu0 %v1772_v0 }
  0xee   : > { %v342_v33 = vpop.trf.xlu0 }
  0xef   : > { %1355 = vmatmul.mubr.msk.f32.gmra.mxu0 %vm382_vm0, %v342_v33  ;;  %v374_v49 = vpop.trf.xlu1 }
  0xf0   : > { %597 = vmatprep.mubr.f32.mxu0 %v1772_v0 }
  0xf2   : > { %v343_v35 = vpop.trf.xlu0 }
  0xf3   : > { %1356 = vmatmul.mubr.msk.f32.gmra.mxu0 %vm382_vm0, %v343_v35  ;;  %v375_v50 = vpop.trf.xlu1 }
  0xf4   : > { %603 = vmatprep.mubr.f32.mxu0 %v1772_v0 }
  0xf6   : > { %v344_v37 = vpop.trf.xlu0 }
  0xf7   : > { %1357 = vmatmul.mubr.msk.f32.gmra.mxu0 %vm382_vm0, %v344_v37  ;;  %v376_v51 = vpop.trf.xlu1 }
  0xf8   : > { %609 = vmatprep.mubr.f32.mxu0 %v1772_v0 }
  0xfa   : > { %v345_v38 = vpop.trf.xlu0 }
  0xfb   : > { %1358 = vmatmul.mubr.msk.f32.gmra.mxu0 %vm382_vm0, %v345_v38  ;;  %v377_v52 = vpop.trf.xlu1 }
  0xfc   : > { %615 = vmatprep.mubr.f32.mxu0 %v1772_v0 }
  0xfe   : > { %v346_v40 = vpop.trf.xlu0 }
  0xff   : > { %1359 = vmatmul.mubr.msk.f32.gmra.mxu0 %vm382_vm0, %v346_v40  ;;  %v378_v53 = vpop.trf.xlu1 }
 0x100   : > { %621 = vmatprep.mubr.f32.mxu0 %v1772_v0 }
 0x102   : > { %v347_v42 = vpop.trf.xlu0 }
 0x103   : > { %1360 = vmatmul.mubr.msk.f32.gmra.mxu0 %vm382_vm0, %v347_v42  ;;  %v379_v54 = vpop.trf.xlu1 }
 0x104   : > { %627 = vmatprep.mubr.f32.mxu0 %v1772_v0 }
 0x106   : > { %v348_v43 = vpop.trf.xlu0 }
 0x107   : > { %1361 = vmatmul.mubr.msk.f32.gmra.mxu0 %vm382_vm0, %v348_v43  ;;  %v380_v55 = vpop.trf.xlu1 }
 0x108   : > { %633 = vmatprep.mubr.f32.mxu0 %v1772_v0 }
 0x10a   : > { %v349_v45 = vpop.trf.xlu0 }
 0x10b   : > { %1362 = vmatmul.mubr.msk.f32.gmra.mxu0 %vm382_vm0, %v349_v45  ;;  %v381_v56 = vpop.trf.xlu1 }
 0x10c   : > { %639 = vmatprep.mubr.f32.mxu0 %v1772_v0 }
 0x10f   : > { %1363 = vmatmul.mubr.msk.f32.gmra.mxu0 %vm382_vm0, %v366_v34 }
 0x110   : > { %645 = vmatprep.mubr.f32.mxu0 %v1772_v0 }
 0x113   : > { %1364 = vmatmul.mubr.msk.f32.gmra.mxu0 %vm382_vm0, %v367_v36 }
 0x114   : > { %651 = vmatprep.mubr.f32.mxu0 %v1772_v0 }
 0x117   : > { %1365 = vmatmul.mubr.msk.f32.gmra.mxu0 %vm382_vm0, %v368_v39 }
 0x118   : > { %657 = vmatprep.mubr.f32.mxu0 %v1772_v0 }
 0x11b   : > { %1366 = vmatmul.mubr.msk.f32.gmra.mxu0 %vm382_vm0, %v369_v41 }
 0x11c   : > { %663 = vmatprep.mubr.f32.mxu0 %v1772_v0 }
 0x11f   : > { %1367 = vmatmul.mubr.msk.f32.gmra.mxu0 %vm382_vm0, %v370_v44 }
 0x120   : > { %669 = vmatprep.mubr.f32.mxu0 %v1772_v0 }
 0x123   : > { %1368 = vmatmul.mubr.msk.f32.gmra.mxu0 %vm382_vm0, %v371_v46 }
 0x124   : > { %675 = vmatprep.mubr.f32.mxu0 %v1772_v0 }
 0x127   : > { %1369 = vmatmul.mubr.msk.f32.gmra.mxu0 %vm382_vm0, %v372_v47 }
 0x128   : > { %681 = vmatprep.mubr.f32.mxu0 %v1772_v0 }
 0x12b   : > { %1370 = vmatmul.mubr.msk.f32.gmra.mxu0 %vm382_vm0, %v373_v48 }
 0x12c   : > { %687 = vmatprep.mubr.f32.mxu0 %v1772_v0 }
 0x12f   : > { %1371 = vmatmul.mubr.msk.f32.gmra.mxu0 %vm382_vm0, %v374_v49 }
 0x130   : > { %693 = vmatprep.mubr.f32.mxu0 %v1772_v0 }
 0x133   : > { %1372 = vmatmul.mubr.msk.f32.gmra.mxu0 %vm382_vm0, %v375_v50 }
 0x134   : > { %699 = vmatprep.mubr.f32.mxu0 %v1772_v0 }
 0x137   : > { %1373 = vmatmul.mubr.msk.f32.gmra.mxu0 %vm382_vm0, %v376_v51 }
 0x138   : > { %705 = vmatprep.mubr.f32.mxu0 %v1772_v0 }
 0x13b   : > { %1374 = vmatmul.mubr.msk.f32.gmra.mxu0 %vm382_vm0, %v377_v52 }
 0x13c   : > { %711 = vmatprep.mubr.f32.mxu0 %v1772_v0 }
 0x13f   : > { %1375 = vmatmul.mubr.msk.f32.gmra.mxu0 %vm382_vm0, %v378_v53 }
 0x140   : > { %717 = vmatprep.mubr.f32.mxu0 %v1772_v0 }
 0x143   : > { %1376 = vmatmul.mubr.msk.f32.gmra.mxu0 %vm382_vm0, %v379_v54 }
 0x144   : > { %723 = vmatprep.mubr.f32.mxu0 %v1772_v0 }
 0x147   : > { %1377 = vmatmul.mubr.msk.f32.gmra.mxu0 %vm382_vm0, %v380_v55 }
 0x148   : > { %729 = vmatprep.mubr.f32.mxu0 %v1772_v0 }
 0x14b   : > { %1378 = vmatmul.mubr.msk.f32.gmra.mxu0 %vm382_vm0, %v381_v56 }
 0x18f   : > { %v2044_v57 = vpop.f32.mrf.mxu0 }
 0x191   : > { %v2046_v58 = vpop.f32.mrf.mxu0 }
 0x193   : > { %v2048_v59 = vpop.f32.mrf.mxu0 }
 0x195   : > { %v2050_v60 = vpop.f32.mrf.mxu0 }
 0x196   : > { %2663 = vst [vmem:[#allocation15_spill] sm:$0xff] %v2050_v60 }
 0x197   : > { %v2052_v61 = vpop.f32.mrf.mxu0 }
 0x198   : > { %v736_v42 = vmax.f32 %v2044_v57, %v2052_v61 }
 0x199   : > { %v2054_v62 = vpop.f32.mrf.mxu0 }
 0x19a   : > { %2664 = vst [vmem:[#allocation16_spill] sm:$0xff] %v2054_v62 }
 0x19b   : > { %v2056_v63 = vpop.f32.mrf.mxu0 }
 0x19c   : > { %v737_v43 = vmax.f32 %v2048_v59, %v2056_v63 }
 0x19d   : > { %v2058_v1 = vpop.f32.mrf.mxu0 }
 0x19e   : > { %2665 = vst [vmem:[#allocation17_spill] sm:$0xff] %v2058_v1 }
 0x19f   : > { %v2060_v2 = vpop.f32.mrf.mxu0 }
 0x1a0   : > { %v738_v45 = vmax.f32 %v736_v42, %v2060_v2 }
 0x1a1   : > { %v2062_v0 = vpop.f32.mrf.mxu0 }
 0x1a3   : > { %v2064_v3 = vpop.f32.mrf.mxu0 }
 0x1a4   : > { %v739_v46 = vmax.f32 %v737_v43, %v2064_v3 }
 0x1a5   : > { %v2066_v4 = vpop.f32.mrf.mxu0 }
 0x1a6   : > { %2666 = vst [vmem:[#allocation18_spill] sm:$0xff] %v2066_v4 }
 0x1a7   : > { %v2068_v5 = vpop.f32.mrf.mxu0 }
 0x1a8   : > { %v740_v48 = vmax.f32 %v738_v45, %v2068_v5 }
 0x1a9   : > { %v2070_v6 = vpop.f32.mrf.mxu0 }
 0x1ab   : > { %v2072_v7 = vpop.f32.mrf.mxu0 }
 0x1ac   : > { %v741_v49 = vmax.f32 %v739_v46, %v2072_v7 }
 0x1ad   : > { %v2074_v8 = vpop.f32.mrf.mxu0 }
 0x1ae   : > { %2667 = vst [vmem:[#allocation19_spill] sm:$0xff] %v2074_v8 }
 0x1af   : > { %v2076_v9 = vpop.f32.mrf.mxu0 }
 0x1b0   : > { %2668 = vst [vmem:[#allocation20_spill] sm:$0xff] %v2076_v9  ;;  %v742_v51 = vmax.f32 %v740_v48, %v2076_v9 }
 0x1b1   : > { %v2078_v10 = vpop.f32.mrf.mxu0 }
 0x1b2   : > { %2669 = vst [vmem:[#allocation21_spill] sm:$0xff] %v2078_v10 }
 0x1b3   : > { %v2080_v11 = vpop.f32.mrf.mxu0 }
 0x1b4   : > { %v743_v52 = vmax.f32 %v741_v49, %v2080_v11 }
 0x1b5   : > { %v2082_v12 = vpop.f32.mrf.mxu0 }
 0x1b6   : > { %2670 = vst [vmem:[#allocation22_spill] sm:$0xff] %v2082_v12 }
 0x1b7   : > { %v2084_v13 = vpop.f32.mrf.mxu0 }
 0x1b8   : > { %2671 = vst [vmem:[#allocation23_spill] sm:$0xff] %v2084_v13  ;;  %v744_v54 = vmax.f32 %v742_v51, %v2084_v13 }
 0x1b9   : > { %v2086_v14 = vpop.f32.mrf.mxu0 }
 0x1bb   : > { %v2088_v15 = vpop.f32.mrf.mxu0 }
 0x1bc   : > { %v745_v55 = vmax.f32 %v743_v52, %v2088_v15 }
 0x1bd   : > { %v2090_v16 = vpop.f32.mrf.mxu0 }
 0x1bf   : > { %v2092_v17 = vpop.f32.mrf.mxu0 }
 0x1c0   : > { %2672 = vst [vmem:[#allocation24_spill] sm:$0xff] %v2092_v17  ;;  %v746_v42 = vmax.f32 %v744_v54, %v2092_v17 }
 0x1c1   : > { %v2094_v18 = vpop.f32.mrf.mxu0 }
 0x1c3   : > { %v2096_v19 = vpop.f32.mrf.mxu0 }
 0x1c4   : > { %v747_v43 = vmax.f32 %v745_v55, %v2096_v19  ;;  %v774_v55 = vmax.f32 %v2050_v60, %v2058_v1 }
 0x1c5   : > { %v2098_v20 = vpop.f32.mrf.mxu0 }
 0x1c7   : > { %v2100_v21 = vpop.f32.mrf.mxu0 }
 0x1c8   : > { %v748_v46 = vmax.f32 %v746_v42, %v2100_v21 }
 0x1c9   : > { %v2102_v22 = vpop.f32.mrf.mxu0 }
 0x1cb   : > { %v2104_v23 = vpop.f32.mrf.mxu0 }
 0x1cc   : > { %2673 = vst [vmem:[#allocation25_spill] sm:$0xff] %v2104_v23  ;;  %v749_v48 = vmax.f32 %v747_v43, %v2104_v23 }
 0x1cd   : > { %v2106_v24 = vpop.f32.mrf.mxu0 }
 0x1cf   : > { %v2108_v25 = vpop.f32.mrf.mxu0 }
 0x1d0   : > { %v750_v49 = vmax.f32 %v748_v46, %v2108_v25  ;;  %v773_v46 = vmax.f32 %v2046_v58, %v2054_v62 }
 0x1d1   : > { %v2110_v26 = vpop.f32.mrf.mxu0 }
 0x1d3   : > { %v2112_v27 = vpop.f32.mrf.mxu0 }
 0x1d4   : > { %v751_v51 = vmax.f32 %v749_v48, %v2112_v27  ;;  %v776_v48 = vmax.f32 %v774_v55, %v2066_v4 }
 0x1d5   : > { %v2114_v28 = vpop.f32.mrf.mxu0 }
 0x1d6   : > { %v778_v1 = vmax.f32 %v776_v48, %v2074_v8 }
 0x1d7   : > { %v2116_v29 = vpop.f32.mrf.mxu0 }
 0x1d8   : > { %2674 = vst [vmem:[#allocation26_spill] sm:$0xff] %v2116_v29  ;;  %v752_v52 = vmax.f32 %v750_v49, %v2116_v29  ;;  %v775_v29 = vmax.f32 %v773_v46, %v2062_v0  ;;  %v780_v55 = vmax.f32 %v778_v1, %v2082_v12 }
 0x1d9   : > { %v2118_v30 = vpop.f32.mrf.mxu0 }
 0x1da   : > { %v777_v62 = vmax.f32 %v775_v29, %v2070_v6  ;;  %v782_v48 = vmax.f32 %v780_v55, %v2090_v16 }
 0x1db   : > { %v2120_v31 = vpop.f32.mrf.mxu0 }
 0x1dc   : > { %2675 = vst [vmem:[#allocation27_spill] sm:$0xff] %v2120_v31  ;;  %v753_v54 = vmax.f32 %v751_v51, %v2120_v31  ;;  %v779_v46 = vmax.f32 %v777_v62, %v2078_v10  ;;  %v784_v1 = vmax.f32 %v782_v48, %v2098_v20 }
 0x1dd   : > { %v2122_v32 = vpop.f32.mrf.mxu0 }
 0x1de   : > { %v781_v29 = vmax.f32 %v779_v46, %v2086_v14  ;;  %v786_v62 = vmax.f32 %v784_v1, %v2106_v24 }
 0x1df   : > { %v2124_v33 = vpop.f32.mrf.mxu0 }
 0x1e0   : > { %v754_v42 = vmax.f32 %v752_v52, %v2124_v33  ;;  %v783_v12 = vmax.f32 %v781_v29, %v2094_v18 }
 0x1e1   : > { %v2126_v34 = vpop.f32.mrf.mxu0 }
 0x1e2   : > { %v785_v55 = vmax.f32 %v783_v12, %v2102_v22 }
 0x1e3   : > { %v2128_v35 = vpop.f32.mrf.mxu0 }
 0x1e4   : > { %v755_v43 = vmax.f32 %v753_v54, %v2128_v35 }
 0x1e5   : > { %v2130_v36 = vpop.f32.mrf.mxu0 }
 0x1e7   : > { %v2132_v37 = vpop.f32.mrf.mxu0 }
 0x1e8   : > { %v756_v49 = vmax.f32 %v754_v42, %v2132_v37 }
 0x1e9   : > { %v2134_v38 = vpop.f32.mrf.mxu0 }
 0x1eb   : > { %v2136_v39 = vpop.f32.mrf.mxu0 }
 0x1ec   : > { %v757_v51 = vmax.f32 %v755_v43, %v2136_v39 }
 0x1ed   : > { %v2138_v40 = vpop.f32.mrf.mxu0 }
 0x1ef   : > { %v2140_v41 = vpop.f32.mrf.mxu0 }
 0x1f0   : > { %v758_v52 = vmax.f32 %v756_v49, %v2140_v41 }
 0x1f1   : > { %v2146_v44 = vpop.f32.mrf.mxu0 }
 0x1f3   : > { %v2150_v47 = vpop.f32.mrf.mxu0 }
 0x1f4   : > { %v759_v54 = vmax.f32 %v757_v51, %v2150_v47 }
 0x1f5   : > { %v2154_v50 = vpop.f32.mrf.mxu0 }
 0x1f7   : > { %v2158_v53 = vpop.f32.mrf.mxu0 }
 0x1f8   : > { %v760_v42 = vmax.f32 %v758_v52, %v2158_v53 }
 0x1f9   : > { %v2162_v56 = vpop.f32.mrf.mxu0 }
 0x1fb   : > { %v2166_v45 = vpop.f32.mrf.mxu0 }
 0x1fc   : > { %v761_v43 = vmax.f32 %v759_v54, %v2166_v45 }
 0x1fd   : > { %v2170_v9 = vpop.f32.mrf.mxu0 }
 0x1ff   : > { %v2174_v13 = vpop.f32.mrf.mxu0 }
 0x200   : > { %2676 = vst [vmem:[#allocation28_spill] sm:$0xff] %v2174_v13  ;;  %v762_v49 = vmax.f32 %v760_v42, %v2174_v13  ;;  %v788_v42 = vmax.f32 %v786_v62, %v2114_v28 }
 0x201   : > { %v2178_v17 = vpop.f32.mrf.mxu0 }
 0x202   : > { %v790_v46 = vmax.f32 %v788_v42, %v2122_v32 }
 0x203   : > { %v2184_v23 = vpop.f32.mrf.mxu0 }
 0x204   : > { %2677 = vst [vmem:[#allocation29_spill] sm:$0xff] %v2184_v23  ;;  %v763_v51 = vmax.f32 %v761_v43, %v2184_v23  ;;  %v787_v23 = vmax.f32 %v785_v55, %v2110_v26 }
 0x205   : > { %v2191_v31 = vpop.f32.mrf.mxu0 }
 0x206   : > { %v789_v48 = vmax.f32 %v787_v23, %v2118_v30 }
 0x207   : > { %v2197_v60 = vpop.f32.mrf.mxu0 }
 0x208   : > { %v764_v52 = vmax.f32 %v762_v49, %v2197_v60  ;;  %v792_v49 = vmax.f32 %v790_v46, %v2130_v36  ;;  %v791_v29 = vmax.f32 %v789_v48, %v2126_v34 }
 0x209   : > { %v2203_v4 = vpop.f32.mrf.mxu0 }
 0x20a   : > { %v794_v1 = vmax.f32 %v792_v49, %v2138_v40  ;;  %v793_v12 = vmax.f32 %v791_v29, %v2134_v38 }
 0x20b   : > { %v2209_v8 = vpop.f32.mrf.mxu0 }
 0x20c   : > { %v765_v54 = vmax.f32 %v763_v51, %v2209_v8  ;;  %v795_v55 = vmax.f32 %v793_v12, %v2146_v44 }
 0x20d   : > { %v2229_v42 = vpop.f32.mrf.mxu0 }
 0x20e   : > { %v766_v10 = vmax.f32 %v764_v52, %v765_v54  ;;  %v796_v54 = vmax.f32 %v794_v1, %v2154_v50  ;;  %v797_v23 = vmax.f32 %v795_v55, %v2162_v56 }
 0x210   : > { %v767_v43 = vrot.slane %v766_v10, 4 }
 0x212   : > { %v768_v13 = vmax.f32 %v766_v10, %v767_v43  ;;  %v798_v10 = vmax.f32 %v796_v54, %v2170_v9  ;;  %v311_v54 = vld [vmem:[%s2247_s18 + $0x8] sm:$0xff] }
 0x213   : > { %1140 = vmatprep.mubr.f32.mxu1 %v311_v54 }
 0x214   : > { %v769_v51 = vrot.slane %v768_v13, 2  ;;  %v800_v43 = vmax.f32 %v798_v10, %v2191_v31 }
 0x216   : > { %v770_v52 = vmax.f32 %v768_v13, %v769_v51  ;;  %v799_v13 = vmax.f32 %v797_v23, %v2178_v17  ;;  %v802_v48 = vmax.f32 %v800_v43, %v2229_v42 }
 0x218   : > { %v771_v62 = vrot.slane %v770_v52, 1  ;;  %v801_v49 = vmax.f32 %v799_v13, %v2203_v4 }
 0x21a   : > { %v2233_v46 = vmax.f32 %v770_v52, %v771_v62  ;;  %v803_v12 = vmax.f32 %v801_v49, %v802_v48 }
 0x21c   : > { %v810_v51 = vsub.f32 %v2044_v57, %v2233_v46  ;;  %v812_v29 = vsub.f32 %v2048_v59, %v2233_v46  ;;  %v814_v1 = vsub.f32 %v2052_v61, %v2233_v46  ;;  %v816_v52 = vsub.f32 %v2056_v63, %v2233_v46 }
 0x21d   : > { %v818_v57 = vsub.f32 %v2060_v2, %v2233_v46  ;;  %v804_v59 = vrot.slane %v803_v12, 4  ;;  %v820_v61 = vsub.f32 %v2064_v3, %v2233_v46  ;;  %v822_v63 = vsub.f32 %v2068_v5, %v2233_v46  ;;  %v2678_v2 = vld [vmem:[#allocation20_spill] sm:$0xff]  ;;  %v2679_v5 = vld [vmem:[#allocation23_spill] sm:$0xff] }
 0x21e   : > { %v874_v62 = vmul.f32 1.442695, %v810_v51  ;;  %v878_v55 = vmul.f32 1.442695, %v812_v29  ;;  %v882_v10 = vmul.f32 1.442695, %v814_v1  ;;  %v824_v48 = vsub.f32 %v2072_v7, %v2233_v46 }
 0x21f   : > { %v886_v23 = vmul.f32 1.442695, %v816_v52  ;;  %v890_v43 = vmul.f32 1.442695, %v818_v57  ;;  %v805_v13 = vmax.f32 %v803_v12, %v804_v59  ;;  %v894_v49 = vmul.f32 1.442695, %v820_v61 }
 0x220   : > { %1465 = vpow2.f32 %v874_v62  ;;  %v826_v51 = vsub.f32 %v2678_v2, %v2233_v46  ;;  %v898_v29 = vmul.f32 1.442695, %v822_v63  ;;  %v828_v3 = vsub.f32 %v2080_v11, %v2233_v46  ;;  %v2680_v59 = vld [vmem:[#allocation24_spill] sm:$0xff] }
 0x221   : > { %1467 = vpow2.f32 %v878_v55  ;;  %v806_v1 = vrot.slane %v805_v13, 2  ;;  %v902_v52 = vmul.f32 1.442695, %v824_v48  ;;  %v830_v54 = vsub.f32 %v2679_v5, %v2233_v46  ;;  %v2681_v48 = vld [vmem:[#allocation25_spill] sm:$0xff] }
 0x222   : > { %1469 = vpow2.f32 %v882_v10  ;;  %v906_v12 = vmul.f32 1.442695, %v826_v51  ;;  %v832_v55 = vsub.f32 %v2088_v15, %v2233_v46  ;;  %v910_v57 = vmul.f32 1.442695, %v828_v3 }
 0x223   : > { %1471 = vpow2.f32 %v886_v23  ;;  %v807_v62 = vmax.f32 %v805_v13, %v806_v1  ;;  %v834_v11 = vsub.f32 %v2680_v59, %v2233_v46  ;;  %v836_v61 = vsub.f32 %v2096_v19, %v2233_v46  ;;  %v2683_v59 = vld [vmem:[#allocation27_spill] sm:$0xff] }
 0x224   : > { %1473 = vpow2.f32 %v890_v43  ;;  %v914_v23 = vmul.f32 1.442695, %v830_v54  ;;  %v838_v15 = vsub.f32 %v2100_v21, %v2233_v46  ;;  %v918_v2 = vmul.f32 1.442695, %v832_v55  ;;  %v2682_v54 = vld [vmem:[#allocation26_spill] sm:$0xff] }
 0x225   : > { %1475 = vpow2.f32 %v894_v49  ;;  %v808_v13 = vrot.slane %v807_v62, 1  ;;  %v840_v49 = vsub.f32 %v2681_v48, %v2233_v46  ;;  %v842_v19 = vsub.f32 %v2108_v25, %v2233_v46 }
 0x226   : > { %1477 = vpow2.f32 %v898_v29  ;;  %v922_v1 = vmul.f32 1.442695, %v834_v11  ;;  %v844_v3 = vsub.f32 %v2112_v27, %v2233_v46  ;;  %v930_v55 = vmul.f32 1.442695, %v838_v15 }
 0x227   : > { %1479 = vpow2.f32 %v902_v52  ;;  %v926_v52 = vmul.f32 1.442695, %v836_v61  ;;  %v934_v25 = vmul.f32 1.442695, %v840_v49  ;;  %v850_v61 = vsub.f32 %v2124_v33, %v2233_v46 }
 0x228   : > { %1481 = vpow2.f32 %v906_v12  ;;  %v846_v12 = vsub.f32 %v2682_v54, %v2233_v46  ;;  %v852_v48 = vsub.f32 %v2128_v35, %v2233_v46  ;;  %v854_v35 = vsub.f32 %v2132_v37, %v2233_v46  ;;  %v2686_v37 = vld [vmem:[#allocation17_spill] sm:$0xff] }
 0x229   : > { %1483 = vpow2.f32 %v910_v57  ;;  %v2294_v57 = vmax.f32 %v807_v62, %v808_v13  ;;  %v942_v62 = vmul.f32 1.442695, %v844_v3  ;;  %v954_v3 = vmul.f32 1.442695, %v850_v61 }
 0x22a   : > { %1485 = vpow2.f32 %v914_v23  ;;  %v938_v23 = vmul.f32 1.442695, %v842_v19  ;;  %v946_v49 = vmul.f32 1.442695, %v846_v12  ;;  %v2684_v19 = vld [vmem:[#allocation15_spill] sm:$0xff] }
 0x22b   : > { %1487 = vpow2.f32 %v918_v2  ;;  %v811_v2 = vsub.f32 %v2046_v58, %v2294_v57  ;;  %v2685_v58 = vld [vmem:[#allocation16_spill] sm:$0xff] }
 0x22c   : > { %1489 = vpow2.f32 %v922_v1  ;;  %v813_v1 = vsub.f32 %v2684_v19, %v2294_v57  ;;  %v815_v12 = vsub.f32 %v2685_v58, %v2294_v57  ;;  %v823_v58 = vsub.f32 %v2070_v6, %v2294_v57 }
 0x22d   : > { %v2264_v7 = vpop.eup %1465  ;;  %1491 = vpow2.f32 %v926_v52  ;;  %v958_v52 = vmul.f32 1.442695, %v852_v48  ;;  %v858_v48 = vsub.f32 %v2140_v41, %v2233_v46  ;;  %v2687_v41 = vld [vmem:[#allocation18_spill] sm:$0xff] }
 0x22e   : > { %v2268_v10 = vpop.eup %1467  ;;  %1493 = vpow2.f32 %v930_v55  ;;  %v880_v61 = vmul.f32 1.442695, %v813_v1  ;;  %v821_v1 = vsub.f32 %v2687_v41, %v2294_v57 }
 0x22f   : > { %v1002_v63 = vadd.f32 %v2268_v10, %v2264_v7  ;;  %v2276_v43 = vpop.eup %1469  ;;  %1495 = vpow2.f32 %v934_v25 }
 0x230   : > { %v2283_v29 = vpop.eup %1471  ;;  %1497 = vpow2.f32 %v938_v23 }
 0x231   : > { %v1003_v51 = vadd.f32 %v2276_v43, %v1002_v63  ;;  %v2290_v5 = vpop.eup %1473  ;;  %v848_v63 = vsub.f32 %v2683_v59, %v2233_v46  ;;  %1499 = vpow2.f32 %v942_v62  ;;  %v856_v59 = vsub.f32 %v2136_v39, %v2233_v46 }
 0x232   : > { %v2299_v27 = vpop.eup %1475  ;;  %1501 = vpow2.f32 %v946_v49  ;;  %v962_v62 = vmul.f32 1.442695, %v854_v35  ;;  %v819_v39 = vsub.f32 %v2062_v0, %v2294_v57  ;;  %v884_v49 = vmul.f32 1.442695, %v815_v12 }
 0x233   : > { %v1004_v21 = vadd.f32 %v2283_v29, %v1003_v51  ;;  %v2306_v13 = vpop.eup %1477  ;;  %v950_v51 = vmul.f32 1.442695, %v848_v63  ;;  %v876_v63 = vmul.f32 1.442695, %v811_v2  ;;  %v862_v0 = vsub.f32 %v2158_v53, %v2233_v46 }
 0x234   : > { %v892_v12 = vmul.f32 1.442695, %v819_v39 }
 0x235   : > { %v1005_v11 = vadd.f32 %v2290_v5, %v1004_v21  ;;  %v2313_v21 = vpop.eup %1479  ;;  %1503 = vpow2.f32 %v950_v51  ;;  %v860_v51 = vsub.f32 %v2150_v47, %v2233_v46  ;;  %v978_v6 = vmul.f32 1.442695, %v862_v0 }
 0x236   : > { %v2320_v55 = vpop.eup %1481  ;;  %1505 = vpow2.f32 %v954_v3 }
 0x237   : > { %v1006_v15 = vadd.f32 %v2299_v27, %v1005_v11  ;;  %v817_v11 = vsub.f32 %v2686_v37, %v2294_v57  ;;  %v2327_v23 = vpop.eup %1483  ;;  %1507 = vpow2.f32 %v958_v52  ;;  %v970_v52 = vmul.f32 1.442695, %v858_v48 }
 0x238   : > { %v2334_v2 = vpop.eup %1485  ;;  %1509 = vpow2.f32 %v876_v63  ;;  %v864_v63 = vsub.f32 %v2166_v45, %v2233_v46  ;;  %v896_v48 = vmul.f32 1.442695, %v821_v1  ;;  %v2692_v1 = vld [vmem:[#allocation22_spill] sm:$0xff] }
 0x239   : > { %v1007_v33 = vadd.f32 %v2306_v13, %v1006_v15  ;;  %1511 = vpow2.f32 %v880_v61  ;;  %v888_v35 = vmul.f32 1.442695, %v817_v11  ;;  %v2341_v3 = vpop.eup %1487  ;;  %v2688_v11 = vld [vmem:[#allocation19_spill] sm:$0xff] }
 0x23a   : > { %1513 = vpow2.f32 %v962_v62  ;;  %v825_v61 = vsub.f32 %v2688_v11, %v2294_v57  ;;  %v982_v41 = vmul.f32 1.442695, %v864_v63 }
 0x23b   : > { %v1008_v54 = vadd.f32 %v2313_v21, %v1007_v33  ;;  %v966_v33 = vmul.f32 1.442695, %v856_v59  ;;  %1515 = vpow2.f32 %v884_v49 }
 0x23d   : > { %v1009_v25 = vadd.f32 %v2320_v55, %v1008_v54  ;;  %v2345_v54 = vpop.eup %1489  ;;  %1517 = vpow2.f32 %v966_v33  ;;  %v900_v33 = vmul.f32 1.442695, %v823_v58 }
 0x23e   : > { %v2350_v59 = vpop.eup %1491  ;;  %1519 = vpow2.f32 %v888_v35  ;;  %v829_v35 = vsub.f32 %v2692_v1, %v2294_v57 }
 0x23f   : > { %v1010_v15 = vadd.f32 %v2327_v23, %v1009_v25  ;;  %v974_v25 = vmul.f32 1.442695, %v860_v51  ;;  %v2354_v37 = vpop.eup %1493  ;;  %1521 = vpow2.f32 %v970_v52  ;;  %v841_v51 = vsub.f32 %v2106_v24, %v2294_v57 }
 0x240   : > { %v2359_v62 = vpop.eup %1495  ;;  %1523 = vpow2.f32 %v892_v12  ;;  %v831_v24 = vsub.f32 %v2086_v14, %v2294_v57 }
 0x241   : > { %v1011_v19 = vadd.f32 %v2334_v2, %v1010_v15  ;;  %v2689_v15 = vld [vmem:[#allocation21_spill] sm:$0xff]  ;;  %v2363_v49 = vpop.eup %1497  ;;  %1525 = vpow2.f32 %v974_v25  ;;  %v837_v25 = vsub.f32 %v2098_v20, %v2294_v57  ;;  %v2696_v20 = vld [vmem:[#allocation28_spill] sm:$0xff] }
 0x242   : > { %v827_v39 = vsub.f32 %v2689_v15, %v2294_v57  ;;  %2690 = vst [vmem:[#allocation20_spill] sm:$0xff] %v2363_v49  ;;  %1527 = vpow2.f32 %v896_v48  ;;  %v936_v15 = vmul.f32 1.442695, %v841_v51  ;;  %v866_v51 = vsub.f32 %v2696_v20, %v2233_v46 }
 0x243   : > { %v1012_v47 = vadd.f32 %v2341_v3, %v1011_v19  ;;  %v2368_v19 = vpop.eup %1499  ;;  %1529 = vpow2.f32 %v978_v6  ;;  %v835_v6 = vsub.f32 %v2094_v18, %v2294_v57  ;;  %v2697_v18 = vld [vmem:[#allocation29_spill] sm:$0xff] }
 0x244   : > { %2691 = vst [vmem:[#allocation23_spill] sm:$0xff] %v2368_v19  ;;  %v2372_v0 = vpop.eup %1501  ;;  %v908_v58 = vmul.f32 1.442695, %v827_v39  ;;  %1531 = vpow2.f32 %v900_v33  ;;  %v916_v33 = vmul.f32 1.442695, %v831_v24 }
 0x245   : > { %v1013_v53 = vadd.f32 %v2345_v54, %v1012_v47  ;;  %2693 = vst [vmem:[#allocation24_spill] sm:$0xff] %v2372_v0  ;;  %v839_v47 = vsub.f32 %v2102_v22, %v2294_v57  ;;  %v2377_v11 = vpop.eup %1503  ;;  %1533 = vpow2.f32 %v982_v41  ;;  %v833_v22 = vsub.f32 %v2090_v16, %v2294_v57 }
 0x246   : > { %2694 = vst [vmem:[#allocation25_spill] sm:$0xff] %v2377_v11  ;;  %v2381_v12 = vpop.eup %1505 }
 0x247   : > { %v1014_v45 = vadd.f32 %v2350_v59, %v1013_v53  ;;  %v904_v53 = vmul.f32 1.442695, %v825_v61  ;;  %2695 = vst [vmem:[#allocation26_spill] sm:$0xff] %v2381_v12  ;;  %v912_v61 = vmul.f32 1.442695, %v829_v35 }
 0x248   : > { %v932_v39 = vmul.f32 1.442695, %v839_v47  ;;  %v928_v35 = vmul.f32 1.442695, %v837_v25  ;;  %v868_v47 = vsub.f32 %v2697_v18, %v2233_v46 }
 0x249   : > { %v1015_v52 = vadd.f32 %v2354_v37, %v1014_v45  ;;  %v2386_v45 = vpop.eup %1507  ;;  %1535 = vpow2.f32 %v904_v53  ;;  %v920_v53 = vmul.f32 1.442695, %v833_v22 }
 0x24a   : > { %v2390_v48 = vpop.eup %1509  ;;  %1537 = vpow2.f32 %v908_v58  ;;  %v924_v58 = vmul.f32 1.442695, %v835_v6  ;;  %v872_v6 = vsub.f32 %v2209_v8, %v2233_v46  ;;  %v843_v8 = vsub.f32 %v2110_v26, %v2294_v57 }
 0x24b   : > { %v1016_v63 = vadd.f32 %v2359_v62, %v1015_v52  ;;  %v2395_v1 = vpop.eup %1511  ;;  %1539 = vpow2.f32 %v936_v15  ;;  %v870_v15 = vsub.f32 %v2197_v60, %v2233_v46  ;;  %v847_v26 = vsub.f32 %v2118_v30, %v2294_v57 }
 0x24c   : > { %v2399_v41 = vpop.eup %1513  ;;  %v1039_v52 = vadd.f32 %v2395_v1, %v2390_v48  ;;  %1541 = vpow2.f32 %v912_v61 }
 0x24d   : > { %v1017_v14 = vadd.f32 %v2363_v49, %v1016_v63  ;;  %v2404_v63 = vpop.eup %1515  ;;  %1543 = vpow2.f32 %v932_v39 }
 0x24e   : > { %v2408_v49 = vpop.eup %1517  ;;  %1545 = vpow2.f32 %v916_v33 }
 0x24f   : > { %v1018_v16 = vadd.f32 %v2368_v19, %v1017_v14  ;;  %v1040_v14 = vadd.f32 %v2404_v63, %v1039_v52  ;;  %v2412_v25 = vpop.eup %1519  ;;  %v986_v19 = vmul.f32 1.442695, %v866_v51  ;;  %1547 = vpow2.f32 %v928_v35 }
 0x250   : > { %v2416_v20 = vpop.eup %1521  ;;  %1549 = vpow2.f32 %v920_v53  ;;  %v994_v52 = vmul.f32 1.442695, %v870_v15  ;;  %v845_v15 = vsub.f32 %v2114_v28, %v2294_v57  ;;  %v849_v28 = vsub.f32 %v2122_v32, %v2294_v57 }
 0x251   : > { %v1019_v24 = vadd.f32 %v2372_v0, %v1018_v16  ;;  %v1041_v22 = vadd.f32 %v2412_v25, %v1040_v14  ;;  %v2420_v18 = vpop.eup %1523  ;;  %v990_v16 = vmul.f32 1.442695, %v868_v47  ;;  %1551 = vpow2.f32 %v924_v58 }
 0x252   : > { %v2424_v39 = vpop.eup %1525  ;;  %1553 = vpow2.f32 %v986_v19  ;;  %v998_v47 = vmul.f32 1.442695, %v872_v6  ;;  %v944_v0 = vmul.f32 1.442695, %v845_v15  ;;  %v948_v32 = vmul.f32 1.442695, %v847_v26 }
 0x253   : > { %v1020_v61 = vadd.f32 %v2377_v11, %v1019_v24  ;;  %v1042_v33 = vadd.f32 %v2420_v18, %v1041_v22  ;;  %v2428_v51 = vpop.eup %1527  ;;  %1555 = vpow2.f32 %v990_v16  ;;  %v853_v15 = vsub.f32 %v2130_v36, %v2294_v57 }
 0x254   : > { %v2430_v35 = vpop.eup %1529  ;;  %1557 = vpow2.f32 %v994_v52 }
 0x255   : > { %v1021_v60 = vadd.f32 %v2381_v12, %v1020_v61  ;;  %v1043_v46 = vadd.f32 %v2428_v51, %v1042_v33  ;;  %v2436_v53 = vpop.eup %1531  ;;  %1559 = vpow2.f32 %v998_v47 }
 0x256   : > { %v2438_v14 = vpop.eup %1533 }
 0x257   : > { %v1022_v24 = vadd.f32 %v2386_v45, %v1021_v60  ;;  %v1044_v19 = vadd.f32 %v2436_v53, %v1043_v46  ;;  %v2444_v61 = vpop.eup %1535  ;;  %v940_v60 = vmul.f32 1.442695, %v843_v8  ;;  %v851_v8 = vsub.f32 %v2126_v34, %v2294_v57 }
 0x258   : > { %v2448_v22 = vpop.eup %1537  ;;  %v952_v34 = vmul.f32 1.442695, %v849_v28  ;;  %v960_v28 = vmul.f32 1.442695, %v853_v15  ;;  %v871_v15 = vsub.f32 %v2203_v4, %v2294_v57 }
 0x259   : > { %v1023_v58 = vadd.f32 %v2399_v41, %v1022_v24  ;;  %v1045_v16 = vadd.f32 %v2444_v61, %v1044_v19  ;;  %v2452_v33 = vpop.eup %1539  ;;  %1561 = vpow2.f32 %v940_v60  ;;  %v855_v60 = vsub.f32 %v2134_v38, %v2294_v57 }
 0x25a   : > { %v1542_v24 = vpop.eup %1541  ;;  %1076 = vmatprep.subr.mxu1 %v2452_v33  ;;  %1563 = vpow2.f32 %v944_v0  ;;  %v857_v0 = vsub.f32 %v2138_v40, %v2294_v57 }
 0x25b   : > { %v1024_v6 = vadd.f32 %v2408_v49, %v1023_v58  ;;  %v1046_v30 = vadd.f32 %v2448_v22, %v1045_v16  ;;  %v1544_v52 = vpop.eup %1543  ;;  %1077 = vmatpush1.msra.mxu1 %v2359_v62  ;;  %1565 = vpow2.f32 %v948_v32  ;;  %v861_v32 = vsub.f32 %v2154_v50, %v2294_v57 }
 0x25c   : > { %v1546_v58 = vpop.eup %1545  ;;  %1078 = vmatprep.subr.mxu1 %v1544_v52  ;;  %1567 = vpow2.f32 %v952_v34 }
 0x25d   : > { %v1025_v46 = vadd.f32 %v2416_v20, %v1024_v6  ;;  %v1047_v11 = vadd.f32 %v1542_v24, %v1046_v30  ;;  %v1548_v47 = vpop.eup %1547  ;;  %1079 = vmatpush1.msra.mxu1 %v2354_v37  ;;  %v859_v30 = vsub.f32 %v2146_v44, %v2294_v57 }
 0x25e   : > { %v1550_v6 = vpop.eup %1549  ;;  %1080 = vmatprep.subr.mxu1 %v1548_v47 }
 0x25f   : > { %v1026_v19 = vadd.f32 %v2424_v39, %v1025_v46  ;;  %v1048_v12 = vadd.f32 %v1546_v58, %v1047_v11  ;;  %v1552_v62 = vpop.eup %1551  ;;  %1081 = vmatpush1.msra.mxu1 %v2350_v59  ;;  %v956_v46 = vmul.f32 1.442695, %v851_v8  ;;  %v972_v50 = vmul.f32 1.442695, %v859_v30 }
 0x260   : > { %1082 = vmatprep.subr.mxu1 %v1552_v62  ;;  %v2471_v37 = vpop.eup %1553 }
 0x261   : > { %v1027_v16 = vadd.f32 %v2430_v35, %v1026_v19  ;;  %v1049_v36 = vadd.f32 %v1550_v6, %v1048_v12  ;;  %1083 = vmatpush1.msra.mxu1 %v2345_v54  ;;  %v2477_v59 = vpop.eup %1555  ;;  %v873_v12 = vsub.f32 %v2229_v42, %v2294_v57  ;;  %1569 = vpow2.f32 %v956_v46 }
 0x262   : > { %1084 = vmatprep.subr.mxu1 %v1550_v6  ;;  %v964_v54 = vmul.f32 1.442695, %v855_v60  ;;  %v2485_v19 = vpop.eup %1557  ;;  %1571 = vpow2.f32 %v960_v28  ;;  %v968_v42 = vmul.f32 1.442695, %v857_v0 }
 0x263   : > { %v1028_v26 = vadd.f32 %v2438_v14, %v1027_v16  ;;  %v1050_v38 = vadd.f32 %v1552_v62, %v1049_v36  ;;  %1085 = vmatpush1.msra.mxu1 %v2341_v3  ;;  %v2493_v6 = vpop.eup %1559 }
 0x264   : > { %1086 = vmatprep.subr.mxu1 %v1546_v58  ;;  %v863_v58 = vsub.f32 %v2162_v56, %v2294_v57  ;;  %1573 = vpow2.f32 %v964_v54  ;;  %v865_v56 = vsub.f32 %v2170_v9, %v2294_v57  ;;  %v314_v54 = vld [vmem:[%s2247_s18 + $0x20] sm:$0xff] }
 0x265   : > { %v1029_v11 = vadd.f32 %v2471_v37, %v1028_v26  ;;  %v1051_v8 = vadd.f32 %v1548_v47, %v1050_v38  ;;  %1087 = vmatpush1.msra.mxu1 %v2334_v2  ;;  %v869_v47 = vsub.f32 %v2191_v31, %v2294_v57  ;;  %v1000_v2 = vmul.f32 1.442695, %v873_v12 }
 0x266   : > { %1088 = vmatprep.subr.mxu1 %v1542_v24  ;;  %v2505_v24 = vpop.eup %1561  ;;  %v867_v31 = vsub.f32 %v2178_v17, %v2294_v57  ;;  %1575 = vpow2.f32 %v968_v42  ;;  %v984_v17 = vmul.f32 1.442695, %v865_v56 }
 0x267   : > { %v1030_v40 = vadd.f32 %v2477_v59, %v1029_v11  ;;  %v1052_v3 = vadd.f32 %v1544_v52, %v1051_v8  ;;  %1089 = vmatpush1.msra.mxu1 %v2327_v23  ;;  %v976_v52 = vmul.f32 1.442695, %v861_v32  ;;  %v996_v23 = vmul.f32 1.442695, %v871_v15  ;;  %v317_v8 = vld [vmem:[%s2247_s18 + $0x38] sm:$0xff] }
 0x268   : > { %1090 = vmatprep.subr.mxu1 %v2448_v22  ;;  %1577 = vpow2.f32 %v972_v50  ;;  %v980_v22 = vmul.f32 1.442695, %v863_v58  ;;  %v992_v62 = vmul.f32 1.442695, %v869_v47  ;;  %v988_v57 = vmul.f32 1.442695, %v867_v31 }
 0x269   : > { %v1031_v44 = vadd.f32 %v2485_v19, %v1030_v40  ;;  %v1053_v16 = vadd.f32 %v2452_v33, %v1052_v3  ;;  %1091 = vmatpush1.msra.mxu1 %v2320_v55  ;;  %v2514_v33 = vpop.eup %1563  ;;  %1579 = vpow2.f32 %v1000_v2 }
 0x26a   : > { %1092 = vmatprep.subr.mxu1 %v2444_v61  ;;  %v2519_v55 = vpop.eup %1565  ;;  %1581 = vpow2.f32 %v976_v52 }
 0x26b   : > { %v2501_v4 = vadd.f32 %v2493_v6, %v1031_v44  ;;  %v1054_v34 = vadd.f32 %v2505_v24, %v1053_v16  ;;  %1093 = vmatpush1.msra.mxu1 %v2313_v21  ;;  %1583 = vpow2.f32 %v996_v23  ;;  %v2524_v60 = vpop.eup %1567 }
 0x26c   : > { %1094 = vmatprep.subr.mxu1 %v2436_v53  ;;  %1585 = vpow2.f32 %v980_v22 }
 0x26d   : > { %v1055_v9 = vadd.f32 %v2514_v33, %v1054_v34  ;;  %1095 = vmatpush1.msra.mxu1 %v2306_v13  ;;  %1587 = vpow2.f32 %v992_v62  ;;  %v1033_v32 = vrot.slane %v2501_v4, 4 }
 0x26e   : > { %1096 = vmatprep.subr.mxu1 %v2428_v51  ;;  %v1570_v53 = vpop.eup %1569  ;;  %1589 = vpow2.f32 %v984_v17 }
 0x26f   : > { %v1056_v61 = vadd.f32 %v2519_v55, %v1055_v9  ;;  %1097 = vmatpush1.msra.mxu1 %v2299_v27  ;;  %1591 = vpow2.f32 %v988_v57  ;;  %v1572_v26 = vpop.eup %1571  ;;  %v1034_v44 = vadd.f32 %v1033_v32, %v2501_v4 }
 0x270   : > { %1098 = vmatprep.subr.mxu1 %v2420_v18 }
 0x271   : > { %v1057_v21 = vadd.f32 %v2524_v60, %v1056_v61  ;;  %1099 = vmatpush1.msra.mxu1 %v2290_v5  ;;  %v1574_v27 = vpop.eup %1573  ;;  %v1035_v3 = vrot.slane %v1034_v44, 2 }
 0x272   : > { %1100 = vmatprep.subr.mxu1 %v2412_v25 }
 0x273   : > { %v1058_v13 = vadd.f32 %v1570_v53, %v1057_v21  ;;  %1101 = vmatpush1.msra.mxu1 %v2283_v29  ;;  %v1576_v18 = vpop.eup %1575  ;;  %v1036_v58 = vadd.f32 %v1035_v3, %v1034_v44 }
 0x274   : > { %1102 = vmatprep.subr.mxu1 %v2404_v63 }
 0x275   : > { %v1059_v51 = vadd.f32 %v1572_v26, %v1058_v13  ;;  %1103 = vmatpush1.msra.mxu1 %v2276_v43  ;;  %v1578_v5 = vpop.eup %1577  ;;  %v1037_v50 = vrot.slane %v1036_v58, 1 }
 0x276   : > { %1104 = vmatprep.subr.mxu1 %v2395_v1  ;;  %v1580_v25 = vpop.eup %1579 }
 0x277   : > { %v1060_v46 = vadd.f32 %v1574_v27, %v1059_v51  ;;  %1105 = vmatpush1.msra.mxu1 %v2268_v10  ;;  %v1582_v29 = vpop.eup %1581  ;;  %v1038_v16 = vadd.f32 %v1037_v50, %v1036_v58 }
 0x278   : > { %1106 = vmatprep.subr.mxu1 %v2390_v48  ;;  %v1584_v63 = vpop.eup %1583 }
 0x279   : > { %v1061_v36 = vadd.f32 %v1576_v18, %v1060_v46  ;;  %1107 = vmatpush1.msra.mxu1 %v2264_v7  ;;  %v1586_v43 = vpop.eup %1585  ;;  %1593 = vrcp.f32 %v1038_v16 }
 0x27a   : > { %1108 = vmatprep.subr.mxu1 %v1580_v25  ;;  %v1588_v1 = vpop.eup %1587 }
 0x27b   : > { %v1062_v0 = vadd.f32 %v1578_v5, %v1061_v36  ;;  %1109 = vmatpush2.msra.mxu1 %v2493_v6  ;;  %v1590_v10 = vpop.eup %1589 }
 0x27c   : > { %1110 = vmatprep.subr.mxu1 %v1584_v63  ;;  %v1592_v38 = vpop.eup %1591 }
 0x27d   : > { %v1063_v11 = vadd.f32 %v1582_v29, %v1062_v0  ;;  %1111 = vmatpush2.msra.mxu1 %v2485_v19  ;;  %v316_v19 = vld [vmem:[%s2247_s18 + $0x30] sm:$0xff] }
 0x27e   : > { %1112 = vmatprep.subr.mxu1 %v1588_v1 }
 0x27f   : > { %v1064_v28 = vadd.f32 %v1586_v43, %v1063_v11  ;;  %1113 = vmatpush2.msra.mxu1 %v2477_v59  ;;  %v315_v59 = vld [vmem:[%s2247_s18 + $0x28] sm:$0xff] }
 0x280   : > { %1114 = vmatprep.subr.mxu1 %v1592_v38 }
 0x281   : > { %v1065_v48 = vadd.f32 %v1590_v10, %v1064_v28  ;;  %1115 = vmatpush2.msra.mxu1 %v2471_v37  ;;  %v312_v37 = vld [vmem:[%s2247_s18 + $0x10] sm:$0xff] }
 0x282   : > { %1116 = vmatprep.subr.mxu1 %v1590_v10 }
 0x283   : > { %v1066_v7 = vadd.f32 %v1592_v38, %v1065_v48  ;;  %1117 = vmatpush2.msra.mxu1 %v2438_v14  ;;  %v2702_v14 = vld [vmem:[#allocation20_spill] sm:$0xff] }
 0x284   : > { %1118 = vmatprep.subr.mxu1 %v1586_v43 }
 0x285   : > { %v1067_v30 = vadd.f32 %v1588_v1, %v1066_v7  ;;  %1119 = vmatpush2.msra.mxu1 %v2430_v35  ;;  %v2698_v35 = vld [vmem:[#allocation26_spill] sm:$0xff] }
 0x286   : > { %1120 = vmatprep.subr.mxu1 %v1582_v29  ;;  %v1594_v56 = vpop.eup %1593 }
 0x287   : > { %v1068_v12 = vadd.f32 %v1584_v63, %v1067_v30  ;;  %1121 = vmatpush2.msra.mxu1 %v2424_v39  ;;  %v2699_v39 = vld [vmem:[#allocation25_spill] sm:$0xff] }
 0x288   : > { %1122 = vmatprep.subr.mxu1 %v1578_v5 }
 0x289   : > { %v1069_v40 = vadd.f32 %v1580_v25, %v1068_v12  ;;  %1123 = vmatpush2.msra.mxu1 %v2416_v20  ;;  %v313_v20 = vld [vmem:[%s2247_s18 + $0x18] sm:$0xff] }
 0x28a   : > { %1124 = vmatprep.subr.mxu1 %v1576_v18 }
 0x28b   : > { %1125 = vmatpush2.msra.mxu1 %v2408_v49  ;;  %v2700_v49 = vld [vmem:[#allocation24_spill] sm:$0xff]  ;;  %v1070_v15 = vrot.slane %v1069_v40, 4 }
 0x28c   : > { %1126 = vmatprep.subr.mxu1 %v1574_v27 }
 0x28d   : > { %1127 = vmatpush2.msra.mxu1 %v2399_v41  ;;  %v2701_v41 = vld [vmem:[#allocation23_spill] sm:$0xff]  ;;  %v1071_v42 = vadd.f32 %v1070_v15, %v1069_v40 }
 0x28e   : > { %1128 = vmatprep.subr.mxu1 %v1572_v26 }
 0x28f   : > { %1129 = vmatpush2.msra.mxu1 %v2386_v45  ;;  %v310_v45 = vld [vmem:[%s2247_s18] sm:$0xff]  ;;  %v1072_v6 = vrot.slane %v1071_v42, 2 }
 0x290   : > { %1130 = vmatprep.subr.mxu1 %v1570_v53 }
 0x291   : > { %1131 = vmatpush2.msra.mxu1 %v2698_v35  ;;  %v1073_v47 = vadd.f32 %v1072_v6, %v1071_v42 }
 0x292   : > { %1132 = vmatprep.subr.mxu1 %v2524_v60 }
 0x293   : > { %1133 = vmatpush2.msra.mxu1 %v2699_v39  ;;  %v1074_v2 = vrot.slane %v1073_v47, 1 }
 0x294   : > { %1134 = vmatprep.subr.mxu1 %v2519_v55 }
 0x295   : > { %1135 = vmatpush2.msra.mxu1 %v2700_v49 }
 0x296   : > { %1136 = vmatprep.subr.mxu1 %v2514_v33 }
 0x297   : > { %1137 = vmatpush2.msra.mxu1 %v2701_v41 }
 0x298   : > { %1138 = vmatprep.subr.mxu1 %v2505_v24  ;;  %v1075_v24 = vadd.f32 %v1074_v2, %v1073_v47 }
 0x299   : > { %1139 = vmatpush2.msra.mxu1 %v2702_v14 }
 0x29a   : > { %1141 = vmatmul.mubr.f32.vlgmr.msra.gmra.mxu1 %v310_v45  ;;  %1595 = vrcp.f32 %v1075_v24 }
 0x29b   : > { %1146 = vmatprep.mubr.f32.mxu1 %v313_v20 }
 0x29e   : > { %1147 = vmatmul.mubr.f32.gmra.mxu1 %v312_v37 }
 0x29f   : > { %1152 = vmatprep.mubr.f32.mxu1 %v315_v59 }
 0x2a2   : > { %1153 = vmatmul.mubr.f32.gmra.mxu1 %v314_v54 }
 0x2a3   : > { %1158 = vmatprep.mubr.f32.mxu1 %v317_v8 }
 0x2a6   : > { %1159 = vmatmul.mubr.f32.gmra.mxu1 %v316_v19 }
 0x2a7   : > { %v1596_v23 = vpop.eup %1595 }
 0x35a   : > { %v1142_v52 = vpop.f32.mrf.mxu1 }
 0x35b   : > { %v1167_v31 = vmul.f32 %v1594_v56, %v1142_v52 }
 0x35c   : > { %v1144_v34 = vpop.f32.mrf.mxu1 }
 0x35d   : > { %1175 = vst [vmem:[%s283_s24] sm:$0xff] %v1167_v31  ;;  %v1168_v4 = vmul.f32 %v1596_v23, %v1144_v34 }
 0x35e   : > { %v1148_v33 = vpop.f32.mrf.mxu1 }
 0x35f   : > { %1176 = vst [vmem:[%s283_s24 + $0x8] sm:$0xff] %v1168_v4  ;;  %v1169_v22 = vmul.f32 %v1594_v56, %v1148_v33 }
 0x360   : > { %v1150_v62 = vpop.f32.mrf.mxu1 }
 0x361   : > { %1177 = vst [vmem:[%s283_s24 + $0x10] sm:$0xff] %v1169_v22  ;;  %v1170_v9 = vmul.f32 %v1596_v23, %v1150_v62 }
 0x362   : > { %v1154_v55 = vpop.f32.mrf.mxu1 }
 0x363   : > { %1178 = vst [vmem:[%s283_s24 + $0x18] sm:$0xff] %v1170_v9  ;;  %v1171_v17 = vmul.f32 %v1594_v56, %v1154_v55 }
 0x364   : > { %v1156_v57 = vpop.f32.mrf.mxu1 }
 0x365   : > { %1179 = vst [vmem:[%s283_s24 + $0x20] sm:$0xff] %v1171_v17  ;;  %v1172_v61 = vmul.f32 %v1596_v23, %v1156_v57 }
 0x366   : > { %v1160_v60 = vpop.f32.mrf.mxu1 }
 0x367   : > { %1180 = vst [vmem:[%s283_s24 + $0x28] sm:$0xff] %v1172_v61  ;;  %v1173_v21 = vmul.f32 %v1594_v56, %v1160_v60 }
 0x368   : > { %v1162_v53 = vpop.f32.mrf.mxu1 }
 0x369   : > { %1181 = vst [vmem:[%s283_s24 + $0x30] sm:$0xff] %v1173_v21  ;;  %v1174_v13 = vmul.f32 %v1596_v23, %v1162_v53 }
 0x36b   : > { %1182 = vst [vmem:[%s283_s24 + $0x38] sm:$0xff] %v1174_v13 }
 0x36c   : > { %1694 = shalt.err (!%p1691_p4)
}
 0x36d   : > { %s1695_s8 = scalar_lea.hbm %s2574_s16, 1024  ;;  %s1699_s4 = scalar_lea.hbm %s2624_s3, 8192 }
 0x36e   : > { %p1696_p0 = scmp.ne.s32.totalorder %s2574_s16, %s1695_s8  ;;  %p1700_p6 = scmp.lt.s32.totalorder %s2574_s16, %s2624_s3 }
 0x36f   : > { %p1701_p7 = scmp.lt.s32.totalorder %s1699_s4, %s1695_s8 }
 0x370   : > { %p1697_p1 = pnand %p1696_p0, %p1851_p9 }
 0x371   : > { %p1702_p8 = por %p1701_p7, %p1700_p6 }
 0x372   : > { %p1698_p5 = pneg %p1697_p1 }
 0x374   : > { %p1703_p13 = pnand %p1702_p8, %p1698_p5 }
 0x376   : > { %1706 = shalt.err (!%p1703_p13)
}
 0x377   : > { %s1774_s20 = smov 256   ;;  %s1775_s30 = smov 16  }
 0x378   : > { %1394 = dma.vmem_to_hbm [thread:$0]  (%p1851_p9), %s2569_s5, 1024, %s2574_s16, %s1184_s28, %s1774_s20, %s1774_s20, %s1775_s30  }
 0x379 PF: > { %p1411_p2 = scmp.ge.s32.totalorder %s1765_s17, 2  ;;  %s1214_s11 = sand.u32 1, %s1745_s12  }
 0x37a   : > { %s1215_s18 = scalar_lea.sflag [#allocation4], %s1214_s11 }
 0x37b   : > { %p1407_p3 = pnand %p1411_p2, %p1858_p11 }
 0x37d   : > { %p1408_p10 = pneg %p1407_p3 }
 0x37f   : > { %1740 = dma.done.wait (%p1408_p10), %s1215_s18, 1024  }
 0x380   : > { %1742 = vsyncadd (%p1408_p10), %s1215_s18, 4294966272  ;;  %s22_s17 = sadd.s32 1, %s1765_s17   ;;  %s2703_s25 = sld [smem:[#allocation14_spill]] }
 0x381   : > { %p19_p12 = scmp.ge.s32.totalorder %s22_s17, 10   ;;  %s2704_s15 = sld [smem:[#allocation12_spill]] }
 0x382   : > { %s2705_s16 = sld [smem:[#allocation13_spill]]  ;;  %s2706_s12 = smov %s1749_s13 }
 0x383   : > { %s2707_s13 = smov %s1753_s14  ;;  %21 = sbr.rel (!%p19_p12) target bundleno = 10 (0xa), region = 101 }
 0x386   : > { %s2708_s14 = smov %s2703_s25 }
 0x388   :  { %1220 = vsyncpa [#allocation3], 1 }
 0x389   :  { %1222 = vsyncpa [#allocation3 + $0x1], 1 }
 0x38a   :  { %1223 = vsyncpa [#allocation6], 1 }
 0x38b   :  { %1225 = vsyncpa [#allocation6 + $0x1], 1 }
 0x38c   :  { %1226 = vsyncpa [#allocation4], 1 }
 0x38d   :  { %1228 = vsyncpa [#allocation4 + $0x1], 1 }

</bundles_post_ra>
